<compile_context>
chip_gen: v7x
topology: tpu7x:2x2x1
jax: 0.10.0
libtpu: 0.0.40
codegen_flags: <defaults>
</compile_context>

<pallas_src>
import functools

import jax
import jax.numpy as jnp
from jax import lax
from jax.experimental import pallas as pl
from jax.experimental.pallas import tpu as pltpu


def _sigmoid(x):
    return 1.0 / (1.0 + jnp.exp(-x))


def _largest_divisor_leq(n, cap, prefer_multiple_of=1):
    cap = max(1, min(n, cap))
    fallback = 1
    for d in range(cap, 0, -1):
        if n % d == 0:
            if fallback == 1:
                fallback = d
            if d % prefer_multiple_of == 0:
                return d
    return fallback


# --------------------------------------------------------------------------- #
# Phase 1: Conv3d(3x3x3, BN-folded) + bias + ReLU  (+ per-channel sums)
# --------------------------------------------------------------------------- #
def _conv_bn_relu_kernel(x_ref, w_ref, b_ref, y_ref, csum_ref, *, TD, HW, K9, C):
    """One (batch, depth-tile) grid step.

    x_ref   : (1, 1, TD+2, HW, K9) bf16  in-plane 3x3 patches, depth-halo'd
    w_ref   : (3, K9, C)           bf16  per-depth-tap weight (BN scale folded)
    b_ref   : (1, C)               f32   folded BatchNorm bias
    y_ref   : (1, TD, HW, C)       f32   conv+BN+ReLU output
    csum_ref: (1, 1, C)            f32   per-batch channel sums (acc. over t)
    """
    @pl.when(pl.program_id(1) == 0)
    def _init():
        csum_ref[...] = jnp.zeros_like(csum_ref)

    R = TD * HW
    xall = x_ref[0, 0]                                   # (TD+2, HW, K9) bf16
    acc = jnp.dot(xall[0:TD].reshape(R, K9), w_ref[0],
                  preferred_element_type=jnp.float32)
    acc = acc + jnp.dot(xall[1:TD + 1].reshape(R, K9), w_ref[1],
                        preferred_element_type=jnp.float32)
    acc = acc + jnp.dot(xall[2:TD + 2].reshape(R, K9), w_ref[2],
                        preferred_element_type=jnp.float32)
    y = jnp.maximum(acc + b_ref[...], 0.0)               # (R, C) f32
    y_ref[0] = y.reshape(TD, HW, C)
    csum_ref[...] += jnp.sum(y, axis=0, keepdims=True)[None]


# --------------------------------------------------------------------------- #
# Phase 2: DepthAxialAttention3D (lane-dense layout)
# --------------------------------------------------------------------------- #
def _axial_attention_kernel(y_ref, csum_ref, w1_ref, b1_ref, w2t_ref, b2t_ref,
                            wdct_ref, bdct_ref, sblk_ref, bst_ref,
                            o_ref, pad_ref, *, D, TG, inv_dhw):
    """One (batch, hw-group-tile) grid step.

    y_ref   : (1, D, TG, 128) f32   conv output; 128 lanes = (128/C voxels) x C
    csum_ref: (1, 1, C)       f32   per-batch channel sums
    w1,b1   : (C, Cr), (1, Cr)      channel-attention squeeze (1x1x1 conv)
    w2t,b2t : (Cr, 128), (1, 128)   channel-attention excite, lane-tiled
    wdct    : (3, 128)              depthwise depth-conv taps, lane-tiled
    bdct    : (1, 128)              depth-conv bias, lane-tiled
    sblk    : (128, 128)            block-diagonal spatial-attention weight
    bst     : (1, 128)              spatial-attention bias, lane-tiled
    o_ref   : (1, D, TG, 128) f32
    pad_ref : ((D+2)*TG, 128) f32   scratch: depth-zero-padded x_ca
    """
    R = D * TG
    y = y_ref[0].reshape(R, 128)

    # Channel attention: global avg pool -> 1x1 conv -> ReLU -> 1x1 conv -> sigmoid.
    avg = csum_ref[0] * inv_dhw                                       # (1, C)
    h1 = jnp.maximum(
        jnp.dot(avg, w1_ref[...], preferred_element_type=jnp.float32,
                precision=lax.Precision.HIGHEST) + b1_ref[...], 0.0)
    ca = _sigmoid(
        jnp.dot(h1, w2t_ref[...], preferred_element_type=jnp.float32,
                precision=lax.Precision.HIGHEST) + b2t_ref[...])      # (1, 128)
    x_ca = y * ca

    # Depthwise depth conv (k=3, pad=1, groups=C): one depth step == TG rows.
    pad_ref[pl.ds(TG, R)] = x_ca
    zrow = jnp.zeros((TG, 128), jnp.float32)
    pad_ref[pl.ds(0, TG)] = zrow
    pad_ref[pl.ds(R + TG, TG)] = zrow
    x_prev = pad_ref[pl.ds(0, R)]
    x_next = pad_ref[pl.ds(2 * TG, R)]
    wdct = wdct_ref[...]
    z = (x_prev * wdct[0:1] + x_ca * wdct[1:2] + x_next * wdct[2:3]
         + bdct_ref[...])

    # Spatial attention: per-voxel 1x1x1 conv (C -> 1) + sigmoid, as a
    # block-diagonal matmul whose result is broadcast across each voxel's lanes.
    sa = _sigmoid(
        jnp.dot(z, sblk_ref[...], preferred_element_type=jnp.float32,
                precision=lax.Precision.HIGHEST) + bst_ref[...])

    o_ref[0] = (x_ca * sa + y).reshape(D, TG, 128)


# --------------------------------------------------------------------------- #
# Wrapper
# --------------------------------------------------------------------------- #
def conv_bn_relu3d_axial_attention(x, params):
    """x: (N, Cin, D, H, W) float32 (PyTorch NCDHW). Returns (N, Cout, D, H, W)."""
    N, Cin, D, H, W = x.shape
    C = params["wconv"].shape[-1]
    Cr = params["w1"].shape[-1]
    HW = H * W
    DHW = D * HW
    K9 = 9 * Cin

    if 128 % C != 0:
        raise ValueError("out_channels must divide 128 for the lane-dense layout")
    rep = 128 // C
    if HW % rep != 0:
        raise ValueError("H*W must be a multiple of 128 // out_channels")
    G = HW * C // 128            # number of 128-lane voxel groups per depth plane

    # ---- layout glue (no math): channels-last bf16, in-plane 3x3 taps --------
    x_cl = jnp.transpose(x, (0, 2, 3, 4, 1)).astype(jnp.bfloat16)   # (N,D,H,W,Ci)
    xp = jnp.pad(x_cl, ((0, 0), (0, 0), (1, 1), (1, 1), (0, 0)))
    cols = [xp[:, :, kh:kh + H, kw:kw + W, :]
            for kh in range(3) for kw in range(3)]
    phw = jnp.concatenate(cols, axis=-1).reshape(N, D, HW, K9)
    php = jnp.pad(phw, ((0, 0), (1, 1), (0, 0), (0, 0)))            # depth pad

    # Depth tiling with a duplicated +-1 halo per tile (keeps blocks VMEM-sized).
    td_cap = min(max(1, (2 * 1024 * 1024) // max(1, HW * K9 * 2) - 2),
                 max(1, (2 * 1024 * 1024) // max(1, HW * C * 4)))
    TD = _largest_divisor_leq(D, td_cap)
    nt = D // TD
    xt = jnp.stack([php[:, t * TD: t * TD + TD + 2] for t in range(nt)], axis=1)

    # Conv weight with BN scale folded in, regrouped per depth tap, bf16.
    scale = params["bn_scale"].reshape(-1)
    wfold = params["wconv"] * scale[None, None, None, None, :]
    wc = wfold.reshape(3, K9, C).astype(jnp.bfloat16)
    bias = params["bn_bias"].reshape(1, C).astype(jnp.float32)

    kern1 = functools.partial(_conv_bn_relu_kernel, TD=TD, HW=HW, K9=K9, C=C)
    flops1 = int(2 * N * DHW * 27 * Cin * C)
    bytes1 = int(xt.size * 2 + N * DHW * C * 4 + wc.size * 2 + N * C * 4)

    y, csum = pl.pallas_call(
        kern1,
        out_shape=(jax.ShapeDtypeStruct((N, D, HW, C), jnp.float32),
                   jax.ShapeDtypeStruct((N, 1, C), jnp.float32)),
        grid_spec=pltpu.PrefetchScalarGridSpec(
            num_scalar_prefetch=0,
            grid=(N, nt),
            in_specs=[
                pl.BlockSpec((1, 1, TD + 2, HW, K9),
                             lambda n, t: (n, t, 0, 0, 0)),
                pl.BlockSpec((3, K9, C), lambda n, t: (0, 0, 0)),
                pl.BlockSpec((1, C), lambda n, t: (0, 0)),
            ],
            out_specs=[
                pl.BlockSpec((1, TD, HW, C), lambda n, t: (n, t, 0, 0)),
                pl.BlockSpec((1, 1, C), lambda n, t: (n, 0, 0)),
            ],
        ),
        compiler_params=pltpu.CompilerParams(
            dimension_semantics=("parallel", "arbitrary"),
            vmem_limit_bytes=32 * 1024 * 1024),
        cost_estimate=pl.CostEstimate(flops=flops1, transcendentals=0,
                                      bytes_accessed=bytes1),
    )(xt, wc, bias)

    # ---- phase 2: axial attention in lane-dense layout ------------------------
    y_ld = y.reshape(N, D, G, 128)           # row-major relabel, no data movement
    tg_cap = max(8, (4 * 1024 * 1024) // max(1, D * 128 * 4 * 6))
    TG = _largest_divisor_leq(G, tg_cap, prefer_multiple_of=8)
    ng = G // TG

    w1 = params["w1"].astype(jnp.float32)
    b1 = params["b1"].astype(jnp.float32)
    w2t = jnp.tile(params["w2"], (1, rep)).astype(jnp.float32)      # (Cr, 128)
    b2t = jnp.tile(params["b2"], (1, rep)).astype(jnp.float32)      # (1, 128)
    wdct = jnp.tile(params["wdc"], (1, rep)).astype(jnp.float32)    # (3, 128)
    bdct = jnp.tile(params["bdc"], (1, rep)).astype(jnp.float32)    # (1, 128)
    bst = jnp.tile(params["bs"], (1, 128)).astype(jnp.float32)      # (1, 128)
    ws = params["ws"].reshape(C)
    sblk = jnp.kron(jnp.eye(rep, dtype=jnp.float32),
                    jnp.broadcast_to(ws[:, None], (C, C))).astype(jnp.float32)

    kern2 = functools.partial(_axial_attention_kernel, D=D, TG=TG,
                              inv_dhw=1.0 / float(DHW))
    flops2 = int(2 * N * D * G * 128 * 128 + 12 * N * DHW * C)
    bytes2 = int(2 * N * DHW * C * 4 + 128 * 128 * 4)

    def _full(shape):
        nd = len(shape)
        return pl.BlockSpec(shape, lambda n, g, nd=nd: (0,) * nd)

    out_ld = pl.pallas_call(
        kern2,
        out_shape=jax.ShapeDtypeStruct((N, D, G, 128), jnp.float32),
        grid_spec=pltpu.PrefetchScalarGridSpec(
            num_scalar_prefetch=0,
            grid=(N, ng),
            in_specs=[
                pl.BlockSpec((1, D, TG, 128), lambda n, g: (n, 0, g, 0)),
                pl.BlockSpec((1, 1, C), lambda n, g: (n, 0, 0)),
                _full((C, Cr)),
                _full((1, Cr)),
                _full((Cr, 128)),
                _full((1, 128)),
                _full((3, 128)),
                _full((1, 128)),
                _full((128, 128)),
                _full((1, 128)),
            ],
            out_specs=pl.BlockSpec((1, D, TG, 128), lambda n, g: (n, 0, g, 0)),
            scratch_shapes=[pltpu.VMEM(((D + 2) * TG, 128), jnp.float32)],
        ),
        compiler_params=pltpu.CompilerParams(
            dimension_semantics=("parallel", "parallel"),
            vmem_limit_bytes=32 * 1024 * 1024),
        cost_estimate=pl.CostEstimate(flops=flops2, transcendentals=N * DHW * C,
                                      bytes_accessed=bytes2),
    )(y_ld, csum, w1, b1, w2t, b2t, wdct, bdct, sblk, bst)

    out = out_ld.reshape(N, D, H, W, C)
    return jnp.transpose(out, (0, 4, 1, 2, 3))                      # NCDHW


# --------------------------------------------------------------------------- #
# Parameters + pure-JAX reference
# --------------------------------------------------------------------------- #
def init_params(key, in_channels, out_channels, reduction_ratio=8):
    Cr = max(1, out_channels // reduction_ratio)
    ks = jax.random.split(key, 13)
    f32 = jnp.float32

    wconv = jax.random.normal(ks[0], (3, 3, 3, in_channels, out_channels), f32) * 0.1
    gamma = 1.0 + 0.1 * jax.random.normal(ks[1], (out_channels,), f32)
    beta = 0.1 * jax.random.normal(ks[2], (out_channels,), f32)
    running_mean = 0.1 * jax.random.normal(ks[3], (out_channels,), f32)
    running_var = jnp.abs(1.0 + 0.1 * jax.random.normal(ks[4], (out_channels,), f32))
    eps = 1e-5
    scale = gamma / jnp.sqrt(running_var + eps)
    bias = beta - running_mean * scale

    return {
        "wconv": wconv,                                   # DHWIO (3,3,3,Cin,Cout)
        "bn_scale": scale.reshape(1, out_channels),
        "bn_bias": bias.reshape(1, out_channels),
        "w1": 0.2 * jax.random.normal(ks[5], (out_channels, Cr), f32),
        "b1": 0.05 * jax.random.normal(ks[6], (1, Cr), f32),
        "w2": 0.2 * jax.random.normal(ks[7], (Cr, out_channels), f32),
        "b2": 0.05 * jax.random.normal(ks[8], (1, out_channels), f32),
        "wdc": 0.3 * jax.random.normal(ks[9], (3, out_channels), f32),
        "bdc": 0.05 * jax.random.normal(ks[10], (1, out_channels), f32),
        "ws": 0.2 * jax.random.normal(ks[11], (out_channels, 1), f32),
        "bs": 0.05 * jax.random.normal(ks[12], (1, 1), f32),
    }


def reference(x, params):
    """Pure-JAX reference of the same forward (same bf16 conv operands)."""
    C = params["wconv"].shape[-1]
    scale = params["bn_scale"].reshape(-1)
    bias = params["bn_bias"].reshape(1, 1, 1, 1, C)
    wfold = (params["wconv"] * scale[None, None, None, None, :]).astype(jnp.bfloat16)
    x_cl = jnp.transpose(x, (0, 2, 3, 4, 1)).astype(jnp.bfloat16)
    y = lax.conv_general_dilated(
        x_cl, wfold, (1, 1, 1), [(1, 1)] * 3,
        dimension_numbers=("NDHWC", "DHWIO", "NDHWC"),
        preferred_element_type=jnp.float32)
    y = jnp.maximum(y + bias, 0.0)

    avg = jnp.mean(y, axis=(1, 2, 3))                               # (N, C)
    h1 = jnp.maximum(
        jnp.dot(avg, params["w1"], precision=lax.Precision.HIGHEST)
        + params["b1"], 0.0)
    ca = _sigmoid(
        jnp.dot(h1, params["w2"], precision=lax.Precision.HIGHEST)
        + params["b2"])
    x_ca = y * ca[:, None, None, None, :]

    xpad = jnp.pad(x_ca, ((0, 0), (1, 1), (0, 0), (0, 0), (0, 0)))
    wdc = params["wdc"]
    z = (xpad[:, :-2] * wdc[0] + xpad[:, 1:-1] * wdc[1] + xpad[:, 2:] * wdc[2]
         + params["bdc"].reshape(1, 1, 1, 1, C))
    sa = _sigmoid(
        jnp.einsum("ndhwc,co->ndhwo", z, params["ws"],
                   precision=lax.Precision.HIGHEST) + params["bs"][0, 0])
    out = x_ca * sa + y
    return jnp.transpose(out, (0, 4, 1, 2, 3))


if __name__ == "__main__":
    key = jax.random.PRNGKey(0)
    k_param, k_x = jax.random.split(key)

    N, Cin, Cout, D, H, W = 2, 4, 16, 8, 8, 8
    params = init_params(k_param, Cin, Cout, reduction_ratio=8)
    x = jax.random.normal(k_x, (N, Cin, D, H, W), jnp.float32)      # NCDHW

    out = jax.block_until_ready(conv_bn_relu3d_axial_attention(x, params))
    ref = jax.block_until_ready(reference(x, params))

    assert out.shape == (N, Cout, D, H, W), out.shape
    err = float(jnp.max(jnp.abs(out - ref)))
    assert jnp.allclose(out, ref, rtol=2e-3, atol=2e-3), err
    print("KERNEL_OK")
</pallas_src>

<mosaic_0001>
module attributes {stable_mosaic.version = 11 : i64} {
  func.func @_conv_bn_relu_kernel(%arg0: i32, %arg1: i32, %arg2: memref<1x1x10x64x36xbf16, #tpu.memory_space<vmem>>, %arg3: memref<3x36x16xbf16, #tpu.memory_space<vmem>>, %arg4: memref<1x16xf32, #tpu.memory_space<vmem>>, %arg5: memref<1x8x64x16xf32, #tpu.memory_space<vmem>>, %arg6: memref<1x1x16xf32, #tpu.memory_space<vmem>>) attributes {dimension_semantics = [#tpu.dimension_semantics<parallel>, #tpu.dimension_semantics<arbitrary>], iteration_bounds = array<i64: 2, 1>, scalar_prefetch = 0 : i64, scratch_operands = 0 : i64, tpu.core_type = #tpu.core_type<tc>, window_params = [{transform_indices = @transform_0, window_bounds = array<i64: 1, 1, 10, 64, 36>}, {pipeline_mode = #tpu.pipeline_mode<synchronous>, transform_indices = @transform_1, window_bounds = array<i64: 3, 36, 16>}, {pipeline_mode = #tpu.pipeline_mode<synchronous>, transform_indices = @transform_2, window_bounds = array<i64: 1, 16>}, {transform_indices = @transform_3, window_bounds = array<i64: 1, 8, 64, 16>}, {transform_indices = @transform_4, window_bounds = array<i64: 1, 1, 16>}]} {
    %c0_i32 = arith.constant 0 : i32
    %0 = arith.cmpi eq, %arg1, %c0_i32 : i32
    %1 = arith.extui %0 : i1 to i32
    %c0_i32_0 = arith.constant 0 : i32
    %2 = arith.cmpi ne, %1, %c0_i32_0 : i32
    scf.if %2 {
      %cst_28 = arith.constant 0.000000e+00 : f32
      %37 = vector.broadcast %cst_28 : f32 to vector<1x1x16xf32>
      %c0_29 = arith.constant 0 : index
      %c0_30 = arith.constant 0 : index
      %c0_31 = arith.constant 0 : index
      %38 = vector.load %arg6[%c0_29, %c0_30, %c0_31] : memref<1x1x16xf32, #tpu.memory_space<vmem>>, vector<1x1x16xf32>
      tpu.vector_store %arg6[%c0_29, %c0_30, %c0_31], %37 {strides = array<i32>} : memref<1x1x16xf32, #tpu.memory_space<vmem>>, vector<1x1x16xf32>,
    } else {
    }
    %c0 = arith.constant 0 : index
    %c0_1 = arith.constant 0 : index
    %c0_2 = arith.constant 0 : index
    %c0_3 = arith.constant 0 : index
    %c0_4 = arith.constant 0 : index
    %3 = vector.load %arg2[%c0, %c0_1, %c0_2, %c0_3, %c0_4] : memref<1x1x10x64x36xbf16, #tpu.memory_space<vmem>>, vector<1x1x10x64x36xbf16>
    %4 = vector.shape_cast %3 : vector<1x1x10x64x36xbf16> to vector<10x64x36xbf16>
    %5 = vector.extract_strided_slice %4 {offsets = [0, 0, 0], sizes = [8, 64, 36], strides = [1, 1, 1]} : vector<10x64x36xbf16> to vector<8x64x36xbf16>
    %6 = vector.shape_cast %5 : vector<8x64x36xbf16> to vector<512x36xbf16>
    %c0_5 = arith.constant 0 : index
    %c0_6 = arith.constant 0 : index
    %c0_7 = arith.constant 0 : index
    %7 = vector.load %arg3[%c0_5, %c0_6, %c0_7] : memref<3x36x16xbf16, #tpu.memory_space<vmem>>, vector<1x36x16xbf16>
    %8 = vector.shape_cast %7 : vector<1x36x16xbf16> to vector<36x16xbf16>
    %cst = arith.constant dense<0.000000e+00> : vector<512x16xf32>
    %9 = tpu.matmul %6, %8, %cst {dimension_numbers = #tpu.dot_dimension_numbers<[1], [0], [0], [1], [0, 0, 1, 1], [], []>} : vector<512x36xbf16>, vector<36x16xbf16>, vector<512x16xf32> -> vector<512x16xf32>
    %10 = vector.extract_strided_slice %4 {offsets = [1, 0, 0], sizes = [8, 64, 36], strides = [1, 1, 1]} : vector<10x64x36xbf16> to vector<8x64x36xbf16>
    %11 = vector.shape_cast %10 : vector<8x64x36xbf16> to vector<512x36xbf16>
    %c1 = arith.constant 1 : index
    %c0_8 = arith.constant 0 : index
    %c0_9 = arith.constant 0 : index
    %12 = vector.load %arg3[%c1, %c0_8, %c0_9] : memref<3x36x16xbf16, #tpu.memory_space<vmem>>, vector<1x36x16xbf16>
    %13 = vector.shape_cast %12 : vector<1x36x16xbf16> to vector<36x16xbf16>
    %cst_10 = arith.constant dense<0.000000e+00> : vector<512x16xf32>
    %14 = tpu.matmul %11, %13, %cst_10 {dimension_numbers = #tpu.dot_dimension_numbers<[1], [0], [0], [1], [0, 0, 1, 1], [], []>} : vector<512x36xbf16>, vector<36x16xbf16>, vector<512x16xf32> -> vector<512x16xf32>
    %15 = arith.addf %9, %14 : vector<512x16xf32>
    %16 = vector.extract_strided_slice %4 {offsets = [2, 0, 0], sizes = [8, 64, 36], strides = [1, 1, 1]} : vector<10x64x36xbf16> to vector<8x64x36xbf16>
    %17 = vector.shape_cast %16 : vector<8x64x36xbf16> to vector<512x36xbf16>
    %c2 = arith.constant 2 : index
    %c0_11 = arith.constant 0 : index
    %c0_12 = arith.constant 0 : index
    %18 = vector.load %arg3[%c2, %c0_11, %c0_12] : memref<3x36x16xbf16, #tpu.memory_space<vmem>>, vector<1x36x16xbf16>
    %19 = vector.shape_cast %18 : vector<1x36x16xbf16> to vector<36x16xbf16>
    %cst_13 = arith.constant dense<0.000000e+00> : vector<512x16xf32>
    %20 = tpu.matmul %17, %19, %cst_13 {dimension_numbers = #tpu.dot_dimension_numbers<[1], [0], [0], [1], [0, 0, 1, 1], [], []>} : vector<512x36xbf16>, vector<36x16xbf16>, vector<512x16xf32> -> vector<512x16xf32>
    %21 = arith.addf %15, %20 : vector<512x16xf32>
    %c0_14 = arith.constant 0 : index
    %c0_15 = arith.constant 0 : index
    %22 = vector.load %arg4[%c0_14, %c0_15] : memref<1x16xf32, #tpu.memory_space<vmem>>, vector<1x16xf32>
    %23 = vector.broadcast %22 : vector<1x16xf32> to vector<512x16xf32>
    %24 = arith.addf %21, %23 : vector<512x16xf32>
    %cst_16 = arith.constant 0.000000e+00 : f32
    %25 = vector.broadcast %cst_16 : f32 to vector<512x16xf32>
    %26 = arith.maximumf %24, %25 : vector<512x16xf32>
    %27 = vector.shape_cast %26 : vector<512x16xf32> to vector<8x64x16xf32>
    %c0_17 = arith.constant 0 : index
    %c0_18 = arith.constant 0 : index
    %c0_19 = arith.constant 0 : index
    %c0_20 = arith.constant 0 : index
    %28 = vector.load %arg5[%c0_17, %c0_18, %c0_19, %c0_20] : memref<1x8x64x16xf32, #tpu.memory_space<vmem>>, vector<1x8x64x16xf32>
    %29 = vector.shape_cast %28 : vector<1x8x64x16xf32> to vector<8x64x16xf32>
    %30 = vector.shape_cast %27 : vector<8x64x16xf32> to vector<1x8x64x16xf32>
    tpu.vector_store %arg5[%c0_17, %c0_18, %c0_19, %c0_20], %30 {strides = array<i32>} : memref<1x8x64x16xf32, #tpu.memory_space<vmem>>, vector<1x8x64x16xf32>,
    %c0_21 = arith.constant 0 : index
    %c0_22 = arith.constant 0 : index
    %c0_23 = arith.constant 0 : index
    %31 = vector.load %arg6[%c0_21, %c0_22, %c0_23] : memref<1x1x16xf32, #tpu.memory_space<vmem>>, vector<1x1x16xf32>
    %cst_24 = arith.constant dense<0.000000e+00> : vector<16xf32>
    %32 = vector.multi_reduction <add>, %26, %cst_24 [0] : vector<512x16xf32> to vector<16xf32>
    %33 = vector.shape_cast %32 : vector<16xf32> to vector<1x16xf32>
    %34 = vector.shape_cast %33 : vector<1x16xf32> to vector<1x1x16xf32>
    %35 = arith.addf %31, %34 : vector<1x1x16xf32>
    %c0_25 = arith.constant 0 : index
    %c0_26 = arith.constant 0 : index
    %c0_27 = arith.constant 0 : index
    %36 = vector.load %arg6[%c0_25, %c0_26, %c0_27] : memref<1x1x16xf32, #tpu.memory_space<vmem>>, vector<1x1x16xf32>
    tpu.vector_store %arg6[%c0_25, %c0_26, %c0_27], %35 {strides = array<i32>} : memref<1x1x16xf32, #tpu.memory_space<vmem>>, vector<1x1x16xf32>,
    return
  }
  func.func @transform_0(%arg0: i32, %arg1: i32) -> (i32, i32, i32, i32, i32) {
    %c0_i32 = arith.constant 0 : i32
    %c0_i32_0 = arith.constant 0 : i32
    %c0_i32_1 = arith.constant 0 : i32
    %c0_i32_2 = arith.constant 0 : i32
    return %arg0, %arg1, %c0_i32, %c0_i32_0, %c0_i32_1 : i32, i32, i32, i32, i32
  }
  func.func @transform_1(%arg0: i32, %arg1: i32) -> (i32, i32, i32) {
    %c0_i32 = arith.constant 0 : i32
    %c0_i32_0 = arith.constant 0 : i32
    %c0_i32_1 = arith.constant 0 : i32
    %c0_i32_2 = arith.constant 0 : i32
    return %c0_i32, %c0_i32_0, %c0_i32_1 : i32, i32, i32
  }
  func.func @transform_2(%arg0: i32, %arg1: i32) -> (i32, i32) {
    %c0_i32 = arith.constant 0 : i32
    %c0_i32_0 = arith.constant 0 : i32
    %c0_i32_1 = arith.constant 0 : i32
    return %c0_i32, %c0_i32_0 : i32, i32
  }
  func.func @transform_3(%arg0: i32, %arg1: i32) -> (i32, i32, i32, i32) {
    %c0_i32 = arith.constant 0 : i32
    %c0_i32_0 = arith.constant 0 : i32
    %c0_i32_1 = arith.constant 0 : i32
    return %arg0, %arg1, %c0_i32, %c0_i32_0 : i32, i32, i32, i32
  }
  func.func @transform_4(%arg0: i32, %arg1: i32) -> (i32, i32, i32) {
    %c0_i32 = arith.constant 0 : i32
    %c0_i32_0 = arith.constant 0 : i32
    %c0_i32_1 = arith.constant 0 : i32
    return %arg0, %c0_i32, %c0_i32_0 : i32, i32, i32
  }
}

</mosaic_0001>

<bundles_post_ra>
// kernel: tpu_custom_call.1
= control target key start
LH: loop header
LB: loop body
LE: loop exit
PB: predicated region body
PF: predicated region fallthrough
CT: control target
= control target key end

     0   :  { %10 = vsyncpa [#allocation3], 0  ;;  %s3611_s0 = inlined_call_operand.vmem [shape: bf16[2,1,10,64,36], index: 0, kind: input, shape index: {}]   ;;  %s3612_s1 = inlined_call_operand.vmem [shape: bf16[3,36,16], index: 1, kind: input, shape index: {}]   ;;  %s3613_s2 = inlined_call_operand.vmem [shape: f32[1,16], index: 2, kind: input, shape index: {}]   ;;  %s3614_s3 = inlined_call_operand.vmem [shape: f32[2,8,64,16], index: 3, kind: output, shape index: {0}]   ;;  %s3615_s4 = inlined_call_operand.hbm [shape: f32[2,1,16], index: 4, kind: output, shape index: {1}]  }
   0x1   :  { %12 = vsyncpa [#allocation3 + $0x1], 0  ;;  %s2970_s15 = smov 0   ;;  %s2972_s16 = smov 0  }
   0x2   :  { %s2974_s17 = smov 0   ;;  %s2976_s18 = smov 0  }
   0x3   :  { %s2978_s19 = smov 0   ;;  %s2980_s20 = smov 0  }
   0x4 LB: > { %s2136_s21 = sadd.s32 4294967295, %s2941_s20   ;;  %s2137_s22 = sadd.s32 4294967294, %s2941_s20   ;;  %s2941_s20 = sphi %s2980_s20, %s18_s20   ;;  %s2937_s19 = sphi %s2978_s19, %s3622_s19   ;;  %s2933_s18 = sphi %s2976_s18, %s3621_s18   ;;  %s2929_s17 = sphi %s2974_s17, %s3620_s17   ;;  %s2925_s16 = sphi %s2972_s16, %s3619_s16   ;;  %s2921_s15 = sphi %s2970_s15, %s3618_s15  }
   0x5   : > { %s30_s23 = sadd.s32 1, %s2937_s19  ;;  %s135_s24 = sadd.s32 1, %s2929_s17 }
   0x6   : > { %p32_p0 = scmp.ge.s32.totalorder %s30_s23, 2  ;;  %p145_p1 = scmp.ne.s32.totalorder %s2929_s17, %s2925_s16 }
   0x7   : > { %p146_p2 = scmp.eq.s32.totalorder %s2136_s21, 1  ;;  %p151_p3 = scmp.ne.s32.totalorder %s2925_s16, %s2921_s15 }
   0x8   : > { %s3624_s23 = smov (%p32_p0, %s30_s23), 0  ;;  %p152_p5 = scmp.eq.s32.totalorder %s2137_s22, 1 }
   0x9   : > { %p3010_p4 = por %p146_p2, %p145_p1  ;;  %s132_s26 = ssub.s32 %s2937_s19, %s3624_s23 }
   0xa   : > { %p2140_p6 = scmp.ge.s32.totalorder %s2941_s20, 1  ;;  %p133_p7 = scmp.eq.s32.totalorder %s132_s26, 0 }
   0xb   : > { %p3017_p8 = por %p152_p5, %p151_p3  ;;  %p188_p9 = scmp.lt.s32.totalorder %s2941_s20, 3 }
   0xc   : > { %s3023_s28 = scalar_select %p133_p7, %s2929_s17, %s135_s24  }
   0xd   : > { %p189_p10 = pnand %p2140_p6, %p188_p9 }
   0xe   : > { %v2814_v0 = vld [vmem:[%s3612_s1 + $0x14] sm:$0xff] (!%p189_p10)   ;;  %v2815_v1 = vld [vmem:[%s3612_s1] sm:$0xff] (!%p189_p10)   ;;  %p227_p11 = scmp.lt.s32.totalorder (!%p189_p10), %s2933_s18, 1  ;;  %v2817_v3 = vld [vmem:[%s3612_s1 + $0x8] sm:$0xff] (!%p189_p10)   ;;  %vm617_vm0 = vcmask (!%p189_p10), 1041408   ;;  %vm520_vm1 = vcmask (!%p189_p10), 293888  }
   0xf   : > { %192 = sbr.rel (%p189_p10) target bundleno = 470 (0x1d6), region = 32  ;;  %2409 = vmatprep.subr.bf16.mxu1 (!%p189_p10), %v2814_v0  ;;  %v2816_v2 = vld [vmem:[%s3612_s1 + $0x1c] sm:$0xff] (!%p189_p10)   ;;  %2479 = vmatprep.subr.bf16.mxu0 (!%p189_p10), %v2815_v1  ;;  %v2818_v4 = vld [vmem:[%s3612_s1 + $0x24] ss:$0 sps:$4 sm:$0x33] (!%p189_p10)   ;;  %v2824_v6 = vld [vmem:[%s3612_s1 + $0x28] sm:$0xff] (!%p189_p10)  }
  0x10   : > { %2410 = vmatpush3.bf16.msra.mxu1 (!%p189_p10), %v2814_v0  ;;  %2480 = vmatpush3.bf16.msra.mxu0 (!%p189_p10), %v2815_v1  ;;  %v2819_v5 = vld [vmem:[%s3612_s1 + $0x10] ss:$0 sps:$4 sm:$0x33] (!%p189_p10)   ;;  %v619_v7 = vsel (!%p189_p10), %vm617_vm0, %v2818_v4, 0  ;;  %vm1793_vm2 = vcmask (!%p189_p10), 130048   ;;  %vm252_vm3 = vcmask (!%p189_p10), 122880  }
  0x11   : > { %2411 = vmatprep.subr.bf16.mxu1 (!%p189_p10), %v2816_v2  ;;  %2481 = vmatprep.subr.bf16.mxu0 (!%p189_p10), %v2817_v3  ;;  %v958_v9 = vsel (!%p189_p10), %vm617_vm0, %v2819_v5, 0  ;;  %v2831_v13 = vld [vmem:[%s3612_s1 + $0x30] sm:$0xff] (!%p189_p10)   ;;  %v2838_v19 = vld [vmem:[%s3612_s1 + $0x38] ss:$0 sps:$4 sm:$0x33] (!%p189_p10)   ;;  %s2300_s26 = sshll.u32 (!%p189_p10), %s2933_s18, 4 }
  0x12   : > { %v1303_v21 = vsel (!%p189_p10), %vm617_vm0, %v2838_v19, 0  ;;  %s3560_s6 = scalar_lea.hbm (!%p189_p10), %s3615_s4, %s2300_s26 }
  0x14   : > { %2412 = vmatpush3.bf16.msra.mxu1 (!%p189_p10), %v2816_v2  ;;  %2482 = vmatpush3.bf16.msra.mxu0 (!%p189_p10), %v2817_v3 }
  0x15   : > { %2753 = vmatprep.subr.msk.bf16.mxu1 (!%p189_p10), %vm617_vm0, %v2818_v4  ;;  %2754 = vmatprep.subr.msk.bf16.mxu0 (!%p189_p10), %vm617_vm0, %v2819_v5 }
  0x16   : > { %s3039_s11 = scalar_select %p227_p11, %s2933_s18, 1 }
  0x17   : > { %s2944_s18 = smov [#allocation2]  }
  0x18   : > { %s2757_s22 = smul.u32 320, %s3039_s11  ;;  %2414 = vmatpush3.bf16.msra.mxu1 %v619_v7  ;;  %2484 = vmatpush3.bf16.msra.mxu0 %v958_v9  ;;  %s2303_s13 = sshll.u32 %s3039_s11, 9 }
  0x19   : > { %2619 = vmatprep.subr.bf16.mxu1 %v2815_v1  ;;  %2549 = vmatprep.subr.bf16.mxu0 %v2824_v6  ;;  %s225_s11 = sand.u32 1, %s2925_s16   ;;  %s2867_s9 = sshll.u32 %s2944_s18, 4  ;;  %s2868_s9 = int_to_ptr.vmem [resolvable:$false] %s2867_s9 }
  0x1a   : > { %s3051_s29 = scalar_lea.vmem %s3611_s0, %s2757_s22  ;;  %s3265_s22 = scalar_lea.vmem %s3614_s3, %s2303_s13 }
  0x1b   : > { %v2820_v8 = vld [vmem:[%s3051_s29 + $0x20] sm:$0xff]   ;;  %v2822_v11 = vld [vmem:[%s3051_s29 + $0x28] sm:$0xff]   ;;  %v2825_v14 = vld [vmem:[%s3051_s29 + $0x30] sm:$0xff]   ;;  %s3288_s24 = scalar_lea.vmem [#allocation2], %s225_s11  ;;  %s2006_s7 = scalar_lea.sflag [#allocation3], %s225_s11 }
  0x1c   : > { %v2821_v10 = vld [vmem:[%s3051_s29] sm:$0xff]   ;;  %2415 = vmatprep.mubr.msk.bf16.mxu1 %vm520_vm1, %v2820_v8  ;;  %v2823_v12 = vld [vmem:[%s3051_s29 + $0x8] sm:$0xff]   ;;  %v2826_v15 = vld [vmem:[%s3051_s29 + $0x10] sm:$0xff]   ;;  %s2869_s10 = scalar_lea.vmem %s2868_s9, 32 }
  0x1d   : > { %2485 = vmatprep.mubr.msk.bf16.mxu0 %vm520_vm1, %v2821_v10  ;;  %2416 = vmatmul.mubr.msk.bf16.vlgmr.msra.gmra.mrb[0].mxu1 %vm520_vm1, %v2822_v11  ;;  %v2827_v16 = vld [vmem:[%s3051_s29 + $0x38] sm:$0xff]   ;;  %v2829_v18 = vld [vmem:[%s3051_s29 + $0x40] sm:$0xff]   ;;  %v2830_v20 = vld [vmem:[%s3051_s29 + $0x48] sm:$0xff]  }
  0x1e   : > { %2486 = vmatmul.mubr.msk.bf16.vlgmr.msra.gmra.mrb[0].mxu0 %vm520_vm1, %v2823_v12  ;;  %2622 = vmatpush3.bf16.msra.mxu1 %v2815_v1  ;;  %v2828_v17 = vld [vmem:[%s3051_s29 + $0x18] sm:$0xff]   ;;  %v2832_v22 = vld [vmem:[%s3051_s29 + $0x50] sm:$0xff]   ;;  %v2834_v24 = vld [vmem:[%s3051_s29 + $0x60] sm:$0xff]  }
  0x1f   : > { %2550 = vmatpush3.bf16.msra.mxu0 %v2824_v6  ;;  %2419 = vmatprep.mubr.msk.bf16.mxu1 %vm520_vm1, %v2825_v14  ;;  %v2833_v23 = vld [vmem:[%s3051_s29 + $0x58] sm:$0xff]   ;;  %v2835_v25 = vld [vmem:[%s3051_s29 + $0x68] sm:$0xff]   ;;  %v2836_v26 = vld [vmem:[%s3051_s29 + $0x70] sm:$0xff]  }
  0x20   : > { %2489 = vmatprep.mubr.msk.bf16.mxu0 %vm520_vm1, %v2826_v15  ;;  %2551 = vmatprep.subr.bf16.mxu0 %v2831_v13  ;;  %v2837_v27 = vld [vmem:[%s3051_s29 + $0x78] sm:$0xff]   ;;  %v2839_v28 = vld [vmem:[%s3051_s29 + $0x80] sm:$0xff]   ;;  %v2840_v29 = vld [vmem:[%s3051_s29 + $0x88] sm:$0xff]  }
  0x21   : > { %2620 = vmatprep.subr.bf16.mxu1 %v2817_v3  ;;  %v2841_v30 = vld [vmem:[%s3051_s29 + $0x90] sm:$0xff]   ;;  %v2842_v31 = vld [vmem:[%s3051_s29 + $0x98] sm:$0xff]   ;;  %v2843_v32 = vld [vmem:[%s3051_s29 + $0xa0] sm:$0xff]  }
  0x22   : > { %2623 = vmatpush3.bf16.msra.mxu1 %v2817_v3  ;;  %v2844_v33 = vld [vmem:[%s3051_s29 + $0xa8] sm:$0xff]   ;;  %v2845_v34 = vld [vmem:[%s3051_s29 + $0xb0] sm:$0xff]   ;;  %v2846_v35 = vld [vmem:[%s3051_s29 + $0xb8] sm:$0xff]  }
  0x23   : > { %2552 = vmatpush3.bf16.msra.mxu0 %v2831_v13  ;;  %2755 = vmatprep.subr.msk.bf16.mxu1 %vm617_vm0, %v2819_v5  ;;  %v2847_v36 = vld [vmem:[%s3051_s29 + $0xc0] sm:$0xff]   ;;  %v2848_v37 = vld [vmem:[%s3051_s29 + $0xc8] sm:$0xff]   ;;  %v2849_v38 = vld [vmem:[%s3051_s29 + $0xd0] sm:$0xff]  }
  0x24   : > { %2756 = vmatprep.subr.msk.bf16.mxu0 %vm617_vm0, %v2838_v19  ;;  %v2850_v39 = vld [vmem:[%s3051_s29 + $0xd8] sm:$0xff]   ;;  %v2851_v40 = vld [vmem:[%s3051_s29 + $0xe0] sm:$0xff]   ;;  %v2852_v41 = vld [vmem:[%s3051_s29 + $0xe8] sm:$0xff]  }
  0x25   : > { %2420 = vmatmul.mubr.msk.bf16.gmra.mrb[4].mxu1 %vm520_vm1, %v2827_v16  ;;  %v2853_v42 = vld [vmem:[%s3051_s29 + $0xf0] sm:$0xff]   ;;  %v2854_v43 = vld [vmem:[%s3051_s29 + $0xf8] sm:$0xff]   ;;  %v2855_v44 = vld [vmem:[%s3051_s29 + $0x100] sm:$0xff]  }
  0x26   : > { %2490 = vmatmul.mubr.msk.bf16.gmra.mrb[4].mxu0 %vm520_vm1, %v2828_v17  ;;  %2423 = vmatprep.mubr.msk.bf16.mxu1 %vm520_vm1, %v2829_v18  ;;  %v2856_v45 = vld [vmem:[%s3051_s29 + $0x108] sm:$0xff]   ;;  %v2857_v46 = vld [vmem:[%s3051_s29 + $0x110] sm:$0xff]   ;;  %v2858_v47 = vld [vmem:[%s3051_s29 + $0x118] sm:$0xff]  }
  0x27   : > { %2493 = vmatprep.mubr.msk.bf16.mxu0 %vm520_vm1, %v2820_v8  ;;  %2624 = vmatpush3.bf16.msra.mxu1 %v958_v9  ;;  %v2859_v48 = vld [vmem:[%s3051_s29 + $0x120] sm:$0xff]   ;;  %v2860_v49 = vld [vmem:[%s3051_s29 + $0x128] sm:$0xff]   ;;  %v2861_v50 = vld [vmem:[%s3051_s29 + $0x130] sm:$0xff]  }
  0x28   : > { %2554 = vmatpush3.bf16.msra.mxu0 %v1303_v21  ;;  %v2862_v51 = vld [vmem:[%s3051_s29 + $0x138] sm:$0xff]   ;;  %v3258_v21 = vld [vmem:[%s3613_s2] ss:$0 sm:$0xff]  ;;  %s2022_s29 = sshll.u32 %s3288_s24, 4  ;;  %s3562_s29 = int_to_ptr.vmem [resolvable:$true] %s2022_s29 }
  0x29   : > { %s2863_s8 = scalar_lea.vmem %s3562_s29, 16  ;;  %p2870_p1 = scmp.lt.s32.totalorder %s3562_s29, %s2868_s9 }
  0x2a   : > { %p2864_p12 = scmp.ne.s32.totalorder %s3562_s29, %s2863_s8  ;;  %p2871_p2 = scmp.lt.s32.totalorder %s2869_s10, %s2863_s8 }
  0x2c   : > { %p2865_p13 = pnand %p2864_p12, %p3010_p4  ;;  %p2872_p3 = por %p2871_p2, %p2870_p1 }
  0x2d   : > { %2424 = vmatmul.mubr.msk.bf16.gmra.mrb[8].mxu1 %vm520_vm1, %v2830_v20 }
  0x2e   : > { %2494 = vmatmul.mubr.msk.bf16.gmra.mrb[8].mxu0 %vm520_vm1, %v2822_v11  ;;  %2427 = vmatprep.mubr.msk.bf16.mxu1 %vm520_vm1, %v2832_v22  ;;  %p2866_p0 = pneg %p2865_p13 }
  0x2f   : > { %2497 = vmatprep.mubr.msk.bf16.mxu0 %vm520_vm1, %v2825_v14 }
  0x30   : > { %p2873_p5 = pnand %p2872_p3, %p2866_p0 }
  0x35   : > { %2428 = vmatmul.mubr.msk.bf16.gmra.mrb[12].mxu1 %vm520_vm1, %v2833_v23 }
  0x36   : > { %2498 = vmatmul.mubr.msk.bf16.gmra.mrb[12].mxu0 %vm520_vm1, %v2827_v16  ;;  %2431 = vmatprep.mubr.msk.bf16.mxu1 %vm520_vm1, %v2834_v24 }
  0x37   : > { %2501 = vmatprep.mubr.msk.bf16.mxu0 %vm520_vm1, %v2829_v18 }
  0x3d   : > { %2432 = vmatmul.mubr.msk.bf16.gmra.mrb[16].mxu1 %vm520_vm1, %v2835_v25 }
  0x3e   : > { %2502 = vmatmul.mubr.msk.bf16.gmra.mrb[16].mxu0 %vm520_vm1, %v2830_v20  ;;  %2435 = vmatprep.mubr.msk.bf16.mxu1 %vm520_vm1, %v2836_v26 }
  0x3f   : > { %2505 = vmatprep.mubr.msk.bf16.mxu0 %vm520_vm1, %v2832_v22 }
  0x45   : > { %2436 = vmatmul.mubr.msk.bf16.gmra.mrb[20].mxu1 %vm520_vm1, %v2837_v27 }
  0x46   : > { %2506 = vmatmul.mubr.msk.bf16.gmra.mrb[20].mxu0 %vm520_vm1, %v2833_v23  ;;  %2439 = vmatprep.mubr.msk.bf16.mxu1 %vm520_vm1, %v2839_v28 }
  0x47   : > { %2509 = vmatprep.mubr.msk.bf16.mxu0 %vm520_vm1, %v2834_v24 }
  0x4d   : > { %2440 = vmatmul.mubr.msk.bf16.gmra.mrb[24].mxu1 %vm520_vm1, %v2840_v29 }
  0x4e   : > { %2510 = vmatmul.mubr.msk.bf16.gmra.mrb[24].mxu0 %vm520_vm1, %v2835_v25  ;;  %2443 = vmatprep.mubr.msk.bf16.mxu1 %vm520_vm1, %v2841_v30 }
  0x4f   : > { %2513 = vmatprep.mubr.msk.bf16.mxu0 %vm520_vm1, %v2836_v26 }
  0x55   : > { %2444 = vmatmul.mubr.msk.bf16.gmra.mrb[28].mxu1 %vm520_vm1, %v2842_v31 }
  0x56   : > { %2514 = vmatmul.mubr.msk.bf16.gmra.mrb[28].mxu0 %vm520_vm1, %v2837_v27  ;;  %2447 = vmatprep.mubr.msk.bf16.mxu1 %vm520_vm1, %v2843_v32 }
  0x57   : > { %2555 = vmatprep.mubr.msk.bf16.mxu0 %vm520_vm1, %v2829_v18 }
  0x5d   : > { %2448 = vmatmul.mubr.msk.bf16.gmra.mrb[32].mxu1 %vm520_vm1, %v2844_v33 }
  0x5e   : > { %2556 = vmatmul.mubr.msk.bf16.vlgmr.msra.gmra.mrb[0].mxu0 %vm520_vm1, %v2830_v20  ;;  %2451 = vmatprep.mubr.msk.bf16.mxu1 %vm520_vm1, %v2845_v34 }
  0x5f   : > { %2559 = vmatprep.mubr.msk.bf16.mxu0 %vm520_vm1, %v2832_v22 }
  0x65   : > { %2452 = vmatmul.mubr.msk.bf16.gmra.mrb[36].mxu1 %vm520_vm1, %v2846_v35 }
  0x66   : > { %2560 = vmatmul.mubr.msk.bf16.gmra.mrb[4].mxu0 %vm520_vm1, %v2833_v23  ;;  %2455 = vmatprep.mubr.msk.bf16.mxu1 %vm520_vm1, %v2847_v36 }
  0x67   : > { %2563 = vmatprep.mubr.msk.bf16.mxu0 %vm520_vm1, %v2834_v24 }
  0x6d   : > { %2456 = vmatmul.mubr.msk.bf16.gmra.mrb[40].mxu1 %vm520_vm1, %v2848_v37 }
  0x6e   : > { %2564 = vmatmul.mubr.msk.bf16.gmra.mrb[8].mxu0 %vm520_vm1, %v2835_v25  ;;  %2459 = vmatprep.mubr.msk.bf16.mxu1 %vm520_vm1, %v2849_v38 }
  0x6f   : > { %2567 = vmatprep.mubr.msk.bf16.mxu0 %vm520_vm1, %v2836_v26 }
  0x75   : > { %2460 = vmatmul.mubr.msk.bf16.gmra.mrb[44].mxu1 %vm520_vm1, %v2850_v39 }
  0x76   : > { %2568 = vmatmul.mubr.msk.bf16.gmra.mrb[12].mxu0 %vm520_vm1, %v2837_v27  ;;  %2463 = vmatprep.mubr.msk.bf16.mxu1 %vm520_vm1, %v2851_v40 }
  0x77   : > { %2571 = vmatprep.mubr.msk.bf16.mxu0 %vm520_vm1, %v2839_v28 }
  0x7d   : > { %2464 = vmatmul.mubr.msk.bf16.gmra.mrb[48].mxu1 %vm520_vm1, %v2852_v41 }
  0x7e   : > { %2572 = vmatmul.mubr.msk.bf16.gmra.mrb[16].mxu0 %vm520_vm1, %v2840_v29  ;;  %2467 = vmatprep.mubr.msk.bf16.mxu1 %vm520_vm1, %v2853_v42 }
  0x7f   : > { %2575 = vmatprep.mubr.msk.bf16.mxu0 %vm520_vm1, %v2841_v30 }
  0x85   : > { %2468 = vmatmul.mubr.msk.bf16.gmra.mrb[52].mxu1 %vm520_vm1, %v2854_v43 }
  0x86   : > { %2576 = vmatmul.mubr.msk.bf16.gmra.mrb[20].mxu0 %vm520_vm1, %v2842_v31  ;;  %2471 = vmatprep.mubr.msk.bf16.mxu1 %vm520_vm1, %v2855_v44 }
  0x87   : > { %2579 = vmatprep.mubr.msk.bf16.mxu0 %vm520_vm1, %v2843_v32 }
  0x8d   : > { %2472 = vmatmul.mubr.msk.bf16.gmra.mrb[56].mxu1 %vm520_vm1, %v2856_v45 }
  0x8e   : > { %2580 = vmatmul.mubr.msk.bf16.gmra.mrb[24].mxu0 %vm520_vm1, %v2844_v33  ;;  %2475 = vmatprep.mubr.msk.bf16.mxu1 %vm520_vm1, %v2857_v46 }
  0x8f   : > { %2583 = vmatprep.mubr.msk.bf16.mxu0 %vm520_vm1, %v2845_v34 }
  0x95   : > { %2476 = vmatmul.mubr.msk.bf16.gmra.mrb[60].mxu1 %vm520_vm1, %v2858_v47 }
  0x96   : > { %2584 = vmatmul.mubr.msk.bf16.gmra.mrb[28].mxu0 %vm520_vm1, %v2846_v35  ;;  %2517 = vmatprep.mubr.msk.bf16.mxu1 %vm520_vm1, %v2839_v28 }
  0x97   : > { %2587 = vmatprep.mubr.msk.bf16.mxu0 %vm520_vm1, %v2847_v36 }
  0x9d   : > { %2518 = vmatmul.mubr.msk.bf16.vlgmr.msra.gmra.mrb[32].mxu1 %vm520_vm1, %v2840_v29 }
  0x9e   : > { %2588 = vmatmul.mubr.msk.bf16.gmra.mrb[32].mxu0 %vm520_vm1, %v2848_v37  ;;  %2521 = vmatprep.mubr.msk.bf16.mxu1 %vm520_vm1, %v2841_v30 }
  0x9f   : > { %2591 = vmatprep.mubr.msk.bf16.mxu0 %vm520_vm1, %v2849_v38 }
  0xa5   : > { %2522 = vmatmul.mubr.msk.bf16.gmra.mrb[36].mxu1 %vm520_vm1, %v2842_v31 }
  0xa6   : > { %2592 = vmatmul.mubr.msk.bf16.gmra.mrb[36].mxu0 %vm520_vm1, %v2850_v39  ;;  %2525 = vmatprep.mubr.msk.bf16.mxu1 %vm520_vm1, %v2843_v32 }
  0xa7   : > { %2595 = vmatprep.mubr.msk.bf16.mxu0 %vm520_vm1, %v2851_v40 }
  0xad   : > { %2526 = vmatmul.mubr.msk.bf16.gmra.mrb[40].mxu1 %vm520_vm1, %v2844_v33 }
  0xae   : > { %2596 = vmatmul.mubr.msk.bf16.gmra.mrb[40].mxu0 %vm520_vm1, %v2852_v41  ;;  %2529 = vmatprep.mubr.msk.bf16.mxu1 %vm520_vm1, %v2845_v34 }
  0xaf   : > { %2599 = vmatprep.mubr.msk.bf16.mxu0 %vm520_vm1, %v2853_v42 }
  0xb5   : > { %2530 = vmatmul.mubr.msk.bf16.gmra.mrb[44].mxu1 %vm520_vm1, %v2846_v35 }
  0xb6   : > { %2600 = vmatmul.mubr.msk.bf16.gmra.mrb[44].mxu0 %vm520_vm1, %v2854_v43  ;;  %2533 = vmatprep.mubr.msk.bf16.mxu1 %vm520_vm1, %v2847_v36 }
  0xb7   : > { %2603 = vmatprep.mubr.msk.bf16.mxu0 %vm520_vm1, %v2855_v44 }
  0xbd   : > { %2534 = vmatmul.mubr.msk.bf16.gmra.mrb[48].mxu1 %vm520_vm1, %v2848_v37 }
  0xbe   : > { %2604 = vmatmul.mubr.msk.bf16.gmra.mrb[48].mxu0 %vm520_vm1, %v2856_v45  ;;  %2537 = vmatprep.mubr.msk.bf16.mxu1 %vm520_vm1, %v2849_v38 }
  0xbf   : > { %2607 = vmatprep.mubr.msk.bf16.mxu0 %vm520_vm1, %v2857_v46 }
  0xc5   : > { %2538 = vmatmul.mubr.msk.bf16.gmra.mrb[52].mxu1 %vm520_vm1, %v2850_v39 }
  0xc6   : > { %2608 = vmatmul.mubr.msk.bf16.gmra.mrb[52].mxu0 %vm520_vm1, %v2858_v47  ;;  %2541 = vmatprep.mubr.msk.bf16.mxu1 %vm520_vm1, %v2851_v40 }
  0xc7   : > { %2611 = vmatprep.mubr.msk.bf16.mxu0 %vm520_vm1, %v2859_v48 }
  0xcd   : > { %2542 = vmatmul.mubr.msk.bf16.gmra.mrb[56].mxu1 %vm520_vm1, %v2852_v41 }
  0xce   : > { %2612 = vmatmul.mubr.msk.bf16.gmra.mrb[56].mxu0 %vm520_vm1, %v2860_v49  ;;  %2545 = vmatprep.mubr.msk.bf16.mxu1 %vm520_vm1, %v2853_v42 }
  0xcf   : > { %2615 = vmatprep.mubr.msk.bf16.mxu0 %vm520_vm1, %v2861_v50 }
  0xd5   : > { %2546 = vmatmul.mubr.msk.bf16.gmra.mrb[60].mxu1 %vm520_vm1, %v2854_v43 }
  0xd6   : > { %2616 = vmatmul.mubr.msk.bf16.gmra.mrb[60].mxu0 %vm520_vm1, %v2862_v51 }
  0xf0   : > { %v2417_v52 = vpop.f32.mrb[0].mxu1 }
  0xf1   : > { %v655_v53 = vpop.f32.mrb[1].mxu1 }
  0xf2   : > { %v2418_v54 = vpop.f32.mrb[2].mxu1 }
  0xf3   : > { %v658_v55 = vpop.f32.mrb[3].mxu1 }
  0xf8   : > { %v2421_v56 = vpop.f32.mrb[4].mxu1 }
  0xf9   : > { %v671_v57 = vpop.f32.mrb[5].mxu1 }
  0xfa   : > { %v2422_v58 = vpop.f32.mrb[6].mxu1 }
  0xfb   : > { %v3205_v59 = vpop.f32.mrb[7].mxu1 }
 0x100   : > { %v3207_v60 = vpop.f32.mrb[8].mxu1 }
 0x101   : > { %v3209_v61 = vpop.f32.mrb[9].mxu1 }
 0x102   : > { %v3211_v62 = vpop.f32.mrb[10].mxu1 }
 0x103   : > { %v3213_v63 = vpop.f32.mrb[11].mxu1 }
 0x108   : > { %v3215_v0 = vpop.f32.mrb[12].mxu1 }
 0x109   : > { %v3217_v1 = vpop.f32.mrb[13].mxu1 }
 0x10a   : > { %v3219_v2 = vpop.f32.mrb[14].mxu1 }
 0x10b   : > { %v3221_v3 = vpop.f32.mrb[15].mxu1 }
 0x110   : > { %v3223_v4 = vpop.f32.mrb[16].mxu1 }
 0x111   : > { %v3225_v5 = vpop.f32.mrb[17].mxu1 }
 0x112   : > { %v3227_v6 = vpop.f32.mrb[18].mxu1 }
 0x113   : > { %v3229_v7 = vpop.f32.mrb[19].mxu1 }
 0x118   : > { %v3231_v8 = vpop.f32.mrb[20].mxu1 }
 0x119   : > { %v3233_v9 = vpop.f32.mrb[21].mxu1 }
 0x11a   : > { %v3235_v10 = vpop.f32.mrb[22].mxu1 }
 0x11b   : > { %v3237_v11 = vpop.f32.mrb[23].mxu1 }
 0x120   : > { %v3239_v12 = vpop.f32.mrb[24].mxu1 }
 0x121   : > { %v3241_v13 = vpop.f32.mrb[25].mxu1 }
 0x122   : > { %v3243_v14 = vpop.f32.mrb[26].mxu1 }
 0x123   : > { %v3245_v15 = vpop.f32.mrb[27].mxu1 }
 0x128   : > { %v3247_v16 = vpop.f32.mrb[28].mxu1 }
 0x129   : > { %v3249_v17 = vpop.f32.mrb[29].mxu1 }
 0x12a   : > { %v3251_v18 = vpop.f32.mrb[30].mxu1 }
 0x12b   : > { %v3253_v19 = vpop.f32.mrb[31].mxu1 }
 0x131   : > { %v2557_v20 = vpop.f32.mrb[0].mxu0 }
 0x132   : > { %v2625_v22 = vadd.f32 %v2557_v20, %v2417_v52  ;;  %v1339_v23 = vpop.f32.mrb[1].mxu0 }
 0x133   : > { %v2626_v24 = vadd.f32 %v1339_v23, %v655_v53  ;;  %v2558_v25 = vpop.f32.mrb[2].mxu0 }
 0x134   : > { %v1667_v26 = vadd.f32 %v2625_v22, %v3258_v21  ;;  %v2627_v27 = vadd.f32 %v2558_v25, %v2418_v54  ;;  %v1342_v28 = vpop.f32.mrb[3].mxu0  ;;  %v2943_v54 = vmov 0.0  }
 0x135   : > { %v1665_v29 = vadd.f32 %v2626_v24, %v3258_v21  ;;  %v2628_v30 = vadd.f32 %v1342_v28, %v658_v55  ;;  %253 = vst.msk [vmem:[%s3288_s24] sm:$0x1] %vm252_vm3, %v2943_v54 }
 0x136   : > { %v1731_v31 = vmax.f32 %v1667_v26, 0.0  ;;  %v1668_v32 = vadd.f32 %v2627_v27, %v3258_v21 }
 0x137   : > { %v1729_v33 = vmax.f32 %v1665_v29, 0.0  ;;  %v1666_v34 = vadd.f32 %v2628_v30, %v3258_v21 }
 0x138   : > { %1796 = vst.msk [vmem:[%s3265_s22 + $0x10] sm:$0xff] %vm1793_vm2, %v1731_v31  ;;  %v1732_v35 = vmax.f32 %v1668_v32, 0.0  ;;  %v1862_v44 = vsel %vm1793_vm2, %v1731_v31, 0.0 }
 0x139   : > { %1794 = vst.msk [vmem:[%s3265_s22] sm:$0xff] %vm1793_vm2, %v1729_v33  ;;  %v1730_v36 = vmax.f32 %v1666_v34, 0.0  ;;  %v2561_v37 = vpop.f32.mrb[4].mxu0  ;;  %v1859_v40 = vsel %vm1793_vm2, %v1729_v33, 0.0 }
 0x13a   : > { %1797 = vst.msk [vmem:[%s3265_s22 + $0x18] sm:$0xff] %vm1793_vm2, %v1732_v35  ;;  %v2629_v38 = vadd.f32 %v2561_v37, %v2421_v56  ;;  %v1355_v39 = vpop.f32.mrb[5].mxu0  ;;  %v1864_v55 = vsel %vm1793_vm2, %v1732_v35, 0.0 }
 0x13b   : > { %1795 = vst.msk [vmem:[%s3265_s22 + $0x8] sm:$0xff] %vm1793_vm2, %v1730_v36  ;;  %v1860_v41 = vsel %vm1793_vm2, %v1730_v36, 0.0  ;;  %v2630_v42 = vadd.f32 %v1355_v39, %v671_v57  ;;  %v2562_v43 = vpop.f32.mrb[6].mxu0 }
 0x13c   : > { %v1861_v45 = vadd.f32 %v1860_v41, %v1859_v40  ;;  %v1671_v46 = vadd.f32 %v2629_v38, %v3258_v21  ;;  %v2631_v47 = vadd.f32 %v2562_v43, %v2422_v58  ;;  %v1358_v48 = vpop.f32.mrb[7].mxu0 }
 0x13d   : > { %v1669_v49 = vadd.f32 %v2630_v42, %v3258_v21  ;;  %v2632_v50 = vadd.f32 %v1358_v48, %v3205_v59 }
 0x13e   : > { %v1863_v51 = vadd.f32 %v1862_v44, %v1861_v45  ;;  %v1735_v52 = vmax.f32 %v1671_v46, 0.0  ;;  %v1672_v53 = vadd.f32 %v2631_v47, %v3258_v21 }
 0x13f   : > { %v1733_v56 = vmax.f32 %v1669_v49, 0.0  ;;  %v1670_v57 = vadd.f32 %v2632_v50, %v3258_v21 }
 0x140   : > { %1800 = vst.msk [vmem:[%s3265_s22 + $0x30] sm:$0xff] %vm1793_vm2, %v1735_v52  ;;  %v1865_v58 = vadd.f32 %v1864_v55, %v1863_v51  ;;  %v1736_v59 = vmax.f32 %v1672_v53, 0.0  ;;  %v1870_v34 = vsel %vm1793_vm2, %v1735_v52, 0.0 }
 0x141   : > { %1798 = vst.msk [vmem:[%s3265_s22 + $0x20] sm:$0xff] %vm1793_vm2, %v1733_v56  ;;  %v1866_v20 = vsel %vm1793_vm2, %v1733_v56, 0.0  ;;  %v1734_v22 = vmax.f32 %v1670_v57, 0.0  ;;  %v2565_v23 = vpop.f32.mrb[8].mxu0 }
 0x142   : > { %v1867_v24 = vadd.f32 %v1866_v20, %v1865_v58  ;;  %1801 = vst.msk [vmem:[%s3265_s22 + $0x38] sm:$0xff] %vm1793_vm2, %v1736_v59  ;;  %v2633_v25 = vadd.f32 %v2565_v23, %v3207_v60  ;;  %v1371_v26 = vpop.f32.mrb[9].mxu0  ;;  %v1872_v38 = vsel %vm1793_vm2, %v1736_v59, 0.0 }
 0x143   : > { %1799 = vst.msk [vmem:[%s3265_s22 + $0x28] sm:$0xff] %vm1793_vm2, %v1734_v22  ;;  %v1868_v27 = vsel %vm1793_vm2, %v1734_v22, 0.0  ;;  %v2634_v28 = vadd.f32 %v1371_v26, %v3209_v61  ;;  %v2566_v29 = vpop.f32.mrb[10].mxu0 }
 0x144   : > { %v1869_v30 = vadd.f32 %v1868_v27, %v1867_v24  ;;  %v1675_v31 = vadd.f32 %v2633_v25, %v3258_v21  ;;  %v2635_v32 = vadd.f32 %v2566_v29, %v3211_v62  ;;  %v1374_v33 = vpop.f32.mrb[11].mxu0 }
 0x145   : > { %v1673_v60 = vadd.f32 %v2634_v28, %v3258_v21  ;;  %v2636_v35 = vadd.f32 %v1374_v33, %v3213_v63 }
 0x146   : > { %v1871_v36 = vadd.f32 %v1870_v34, %v1869_v30  ;;  %v1739_v37 = vmax.f32 %v1675_v31, 0.0  ;;  %v1676_v61 = vadd.f32 %v2635_v32, %v3258_v21 }
 0x147   : > { %v1737_v39 = vmax.f32 %v1673_v60, 0.0  ;;  %v1674_v40 = vadd.f32 %v2636_v35, %v3258_v21 }
 0x148   : > { %1804 = vst.msk [vmem:[%s3265_s22 + $0x50] sm:$0xff] %vm1793_vm2, %v1739_v37  ;;  %v1873_v62 = vadd.f32 %v1872_v38, %v1871_v36  ;;  %v1740_v41 = vmax.f32 %v1676_v61, 0.0  ;;  %v1878_v54 = vsel %vm1793_vm2, %v1739_v37, 0.0 }
 0x149   : > { %1802 = vst.msk [vmem:[%s3265_s22 + $0x40] sm:$0xff] %vm1793_vm2, %v1737_v39  ;;  %v1874_v42 = vsel %vm1793_vm2, %v1737_v39, 0.0  ;;  %v1738_v43 = vmax.f32 %v1674_v40, 0.0  ;;  %v2569_v63 = vpop.f32.mrb[12].mxu0 }
 0x14a   : > { %v1875_v44 = vadd.f32 %v1874_v42, %v1873_v62  ;;  %1805 = vst.msk [vmem:[%s3265_s22 + $0x58] sm:$0xff] %vm1793_vm2, %v1740_v41  ;;  %v2637_v45 = vadd.f32 %v2569_v63, %v3215_v0  ;;  %v1387_v46 = vpop.f32.mrb[13].mxu0  ;;  %v1880_v58 = vsel %vm1793_vm2, %v1740_v41, 0.0 }
 0x14b   : > { %1803 = vst.msk [vmem:[%s3265_s22 + $0x48] sm:$0xff] %vm1793_vm2, %v1738_v43  ;;  %v1876_v47 = vsel %vm1793_vm2, %v1738_v43, 0.0  ;;  %v2638_v48 = vadd.f32 %v1387_v46, %v3217_v1  ;;  %v2570_v49 = vpop.f32.mrb[14].mxu0 }
 0x14c   : > { %v1877_v50 = vadd.f32 %v1876_v47, %v1875_v44  ;;  %v1679_v51 = vadd.f32 %v2637_v45, %v3258_v21  ;;  %v2639_v52 = vadd.f32 %v2570_v49, %v3219_v2  ;;  %v1390_v53 = vpop.f32.mrb[15].mxu0 }
 0x14d   : > { %v1677_v0 = vadd.f32 %v2638_v48, %v3258_v21  ;;  %v2640_v55 = vadd.f32 %v1390_v53, %v3221_v3 }
 0x14e   : > { %v1879_v56 = vadd.f32 %v1878_v54, %v1877_v50  ;;  %v1743_v57 = vmax.f32 %v1679_v51, 0.0  ;;  %v1680_v1 = vadd.f32 %v2639_v52, %v3258_v21 }
 0x14f   : > { %v1741_v59 = vmax.f32 %v1677_v0, 0.0  ;;  %v1678_v20 = vadd.f32 %v2640_v55, %v3258_v21 }
 0x150   : > { %1808 = vst.msk [vmem:[%s3265_s22 + $0x70] sm:$0xff] %vm1793_vm2, %v1743_v57  ;;  %v1881_v2 = vadd.f32 %v1880_v58, %v1879_v56  ;;  %v1744_v22 = vmax.f32 %v1680_v1, 0.0  ;;  %v1886_v60 = vsel %vm1793_vm2, %v1743_v57, 0.0 }
 0x151   : > { %1806 = vst.msk [vmem:[%s3265_s22 + $0x60] sm:$0xff] %vm1793_vm2, %v1741_v59  ;;  %v1882_v23 = vsel %vm1793_vm2, %v1741_v59, 0.0  ;;  %v1742_v24 = vmax.f32 %v1678_v20, 0.0  ;;  %v2573_v3 = vpop.f32.mrb[16].mxu0 }
 0x152   : > { %v1883_v25 = vadd.f32 %v1882_v23, %v1881_v2  ;;  %1809 = vst.msk [vmem:[%s3265_s22 + $0x78] sm:$0xff] %vm1793_vm2, %v1744_v22  ;;  %v2641_v26 = vadd.f32 %v2573_v3, %v3223_v4  ;;  %v1403_v27 = vpop.f32.mrb[17].mxu0  ;;  %v1888_v61 = vsel %vm1793_vm2, %v1744_v22, 0.0 }
 0x153   : > { %1807 = vst.msk [vmem:[%s3265_s22 + $0x68] sm:$0xff] %vm1793_vm2, %v1742_v24  ;;  %v1884_v28 = vsel %vm1793_vm2, %v1742_v24, 0.0  ;;  %v2642_v29 = vadd.f32 %v1403_v27, %v3225_v5  ;;  %v2574_v30 = vpop.f32.mrb[18].mxu0 }
 0x154   : > { %v1885_v31 = vadd.f32 %v1884_v28, %v1883_v25  ;;  %v1683_v32 = vadd.f32 %v2641_v26, %v3258_v21  ;;  %v2643_v33 = vadd.f32 %v2574_v30, %v3227_v6  ;;  %v1406_v34 = vpop.f32.mrb[19].mxu0 }
 0x155   : > { %v1681_v4 = vadd.f32 %v2642_v29, %v3258_v21  ;;  %v2644_v35 = vadd.f32 %v1406_v34, %v3229_v7 }
 0x156   : > { %v1887_v36 = vadd.f32 %v1886_v60, %v1885_v31  ;;  %v1747_v37 = vmax.f32 %v1683_v32, 0.0  ;;  %v1684_v5 = vadd.f32 %v2643_v33, %v3258_v21 }
 0x157   : > { %v1745_v38 = vmax.f32 %v1681_v4, 0.0  ;;  %v1682_v39 = vadd.f32 %v2644_v35, %v3258_v21 }
 0x158   : > { %1812 = vst.msk [vmem:[%s3265_s22 + $0x90] sm:$0xff] %vm1793_vm2, %v1747_v37  ;;  %v1889_v6 = vadd.f32 %v1888_v61, %v1887_v36  ;;  %v1748_v40 = vmax.f32 %v1684_v5, 0.0  ;;  %v1894_v51 = vsel %vm1793_vm2, %v1747_v37, 0.0 }
 0x159   : > { %1810 = vst.msk [vmem:[%s3265_s22 + $0x80] sm:$0xff] %vm1793_vm2, %v1745_v38  ;;  %v1890_v62 = vsel %vm1793_vm2, %v1745_v38, 0.0  ;;  %v1746_v41 = vmax.f32 %v1682_v39, 0.0  ;;  %v2577_v7 = vpop.f32.mrb[20].mxu0 }
 0x15a   : > { %v1891_v42 = vadd.f32 %v1890_v62, %v1889_v6  ;;  %1813 = vst.msk [vmem:[%s3265_s22 + $0x98] sm:$0xff] %vm1793_vm2, %v1748_v40  ;;  %v2645_v43 = vadd.f32 %v2577_v7, %v3231_v8  ;;  %v1419_v63 = vpop.f32.mrb[21].mxu0  ;;  %v1896_v0 = vsel %vm1793_vm2, %v1748_v40, 0.0 }
 0x15b   : > { %1811 = vst.msk [vmem:[%s3265_s22 + $0x88] sm:$0xff] %vm1793_vm2, %v1746_v41  ;;  %v1892_v44 = vsel %vm1793_vm2, %v1746_v41, 0.0  ;;  %v2646_v45 = vadd.f32 %v1419_v63, %v3233_v9  ;;  %v2578_v46 = vpop.f32.mrb[22].mxu0 }
 0x15c   : > { %v1893_v47 = vadd.f32 %v1892_v44, %v1891_v42  ;;  %v1687_v48 = vadd.f32 %v2645_v43, %v3258_v21  ;;  %v2647_v49 = vadd.f32 %v2578_v46, %v3235_v10  ;;  %v1422_v50 = vpop.f32.mrb[23].mxu0 }
 0x15d   : > { %v1685_v8 = vadd.f32 %v2646_v45, %v3258_v21  ;;  %v2648_v52 = vadd.f32 %v1422_v50, %v3237_v11 }
 0x15e   : > { %v1895_v53 = vadd.f32 %v1894_v51, %v1893_v47  ;;  %v1751_v54 = vmax.f32 %v1687_v48, 0.0  ;;  %v1688_v9 = vadd.f32 %v2647_v49, %v3258_v21 }
 0x15f   : > { %v1749_v55 = vmax.f32 %v1685_v8, 0.0  ;;  %v1686_v56 = vadd.f32 %v2648_v52, %v3258_v21 }
 0x160   : > { %1816 = vst.msk [vmem:[%s3265_s22 + $0xb0] sm:$0xff] %vm1793_vm2, %v1751_v54  ;;  %v1897_v10 = vadd.f32 %v1896_v0, %v1895_v53  ;;  %v1752_v57 = vmax.f32 %v1688_v9, 0.0  ;;  %v1902_v28 = vsel %vm1793_vm2, %v1751_v54, 0.0 }
 0x161   : > { %1814 = vst.msk [vmem:[%s3265_s22 + $0xa0] sm:$0xff] %vm1793_vm2, %v1749_v55  ;;  %v1898_v1 = vsel %vm1793_vm2, %v1749_v55, 0.0  ;;  %v1750_v58 = vmax.f32 %v1686_v56, 0.0  ;;  %v2581_v11 = vpop.f32.mrb[24].mxu0 }
 0x162   : > { %v1899_v59 = vadd.f32 %v1898_v1, %v1897_v10  ;;  %1817 = vst.msk [vmem:[%s3265_s22 + $0xb8] sm:$0xff] %vm1793_vm2, %v1752_v57  ;;  %v2649_v20 = vadd.f32 %v2581_v11, %v3239_v12  ;;  %v1435_v2 = vpop.f32.mrb[25].mxu0  ;;  %v1904_v32 = vsel %vm1793_vm2, %v1752_v57, 0.0 }
 0x163   : > { %1815 = vst.msk [vmem:[%s3265_s22 + $0xa8] sm:$0xff] %vm1793_vm2, %v1750_v58  ;;  %v1900_v22 = vsel %vm1793_vm2, %v1750_v58, 0.0  ;;  %v2650_v23 = vadd.f32 %v1435_v2, %v3241_v13  ;;  %v2582_v24 = vpop.f32.mrb[26].mxu0 }
 0x164   : > { %v1901_v3 = vadd.f32 %v1900_v22, %v1899_v59  ;;  %v1691_v25 = vadd.f32 %v2649_v20, %v3258_v21  ;;  %v2651_v26 = vadd.f32 %v2582_v24, %v3243_v14  ;;  %v1438_v27 = vpop.f32.mrb[27].mxu0 }
 0x165   : > { %v1689_v12 = vadd.f32 %v2650_v23, %v3258_v21  ;;  %v2652_v29 = vadd.f32 %v1438_v27, %v3245_v15 }
 0x166   : > { %v1903_v30 = vadd.f32 %v1902_v28, %v1901_v3  ;;  %v1755_v31 = vmax.f32 %v1691_v25, 0.0  ;;  %v1692_v13 = vadd.f32 %v2651_v26, %v3258_v21 }
 0x167   : > { %v1753_v33 = vmax.f32 %v1689_v12, 0.0  ;;  %v1690_v34 = vadd.f32 %v2652_v29, %v3258_v21 }
 0x168   : > { %1820 = vst.msk [vmem:[%s3265_s22 + $0xd0] sm:$0xff] %vm1793_vm2, %v1755_v31  ;;  %v1905_v14 = vadd.f32 %v1904_v32, %v1903_v30  ;;  %v1756_v60 = vmax.f32 %v1692_v13, 0.0  ;;  %v1910_v7 = vsel %vm1793_vm2, %v1755_v31, 0.0 }
 0x169   : > { %1818 = vst.msk [vmem:[%s3265_s22 + $0xc0] sm:$0xff] %vm1793_vm2, %v1753_v33  ;;  %v1906_v4 = vsel %vm1793_vm2, %v1753_v33, 0.0  ;;  %v1754_v35 = vmax.f32 %v1690_v34, 0.0  ;;  %v2585_v15 = vpop.f32.mrb[28].mxu0 }
 0x16a   : > { %v1907_v36 = vadd.f32 %v1906_v4, %v1905_v14  ;;  %1821 = vst.msk [vmem:[%s3265_s22 + $0xd8] sm:$0xff] %vm1793_vm2, %v1756_v60  ;;  %v2653_v37 = vadd.f32 %v2585_v15, %v3247_v16  ;;  %v1451_v5 = vpop.f32.mrb[29].mxu0 }
 0x16b   : > { %1819 = vst.msk [vmem:[%s3265_s22 + $0xc8] sm:$0xff] %vm1793_vm2, %v1754_v35  ;;  %v1908_v61 = vsel %vm1793_vm2, %v1754_v35, 0.0  ;;  %v2654_v38 = vadd.f32 %v1451_v5, %v3249_v17  ;;  %v2586_v39 = vpop.f32.mrb[30].mxu0  ;;  %v1912_v17 = vsel %vm1793_vm2, %v1756_v60, 0.0 }
 0x16c   : > { %v1909_v6 = vadd.f32 %v1908_v61, %v1907_v36  ;;  %v1695_v40 = vadd.f32 %v2653_v37, %v3258_v21  ;;  %v2655_v62 = vadd.f32 %v2586_v39, %v3251_v18  ;;  %v1454_v41 = vpop.f32.mrb[31].mxu0 }
 0x16d   : > { %v1693_v16 = vadd.f32 %v2654_v38, %v3258_v21  ;;  %v2656_v42 = vadd.f32 %v1454_v41, %v3253_v19 }
 0x16e   : > { %v1911_v43 = vadd.f32 %v1910_v7, %v1909_v6  ;;  %v1759_v63 = vmax.f32 %v1695_v40, 0.0  ;;  %v1696_v44 = vadd.f32 %v2655_v62, %v3258_v21 }
 0x16f   : > { %v1757_v45 = vmax.f32 %v1693_v16, 0.0  ;;  %v1694_v46 = vadd.f32 %v2656_v42, %v3258_v21 }
 0x170   : > { %1824 = vst.msk [vmem:[%s3265_s22 + $0xf0] sm:$0xff] %vm1793_vm2, %v1759_v63  ;;  %v1913_v18 = vadd.f32 %v1912_v17, %v1911_v43  ;;  %v1760_v47 = vmax.f32 %v1696_v44, 0.0  ;;  %v2519_v48 = vpop.f32.mrb[32].mxu1  ;;  %v1918_v11 = vsel %vm1793_vm2, %v1759_v63, 0.0 }
 0x171   : > { %1822 = vst.msk [vmem:[%s3265_s22 + $0xe0] sm:$0xff] %vm1793_vm2, %v1757_v45  ;;  %v1914_v19 = vsel %vm1793_vm2, %v1757_v45, 0.0  ;;  %v1758_v49 = vmax.f32 %v1694_v46, 0.0  ;;  %v2589_v50 = vpop.f32.mrb[32].mxu0  ;;  %v1122_v51 = vpop.f32.mrb[33].mxu1 }
 0x172   : > { %v1915_v8 = vadd.f32 %v1914_v19, %v1913_v18  ;;  %1825 = vst.msk [vmem:[%s3265_s22 + $0xf8] sm:$0xff] %vm1793_vm2, %v1760_v47  ;;  %v2657_v52 = vadd.f32 %v2589_v50, %v2519_v48  ;;  %v1467_v53 = vpop.f32.mrb[33].mxu0  ;;  %v2520_v54 = vpop.f32.mrb[34].mxu1  ;;  %v1920_v24 = vsel %vm1793_vm2, %v1760_v47, 0.0 }
 0x173   : > { %1823 = vst.msk [vmem:[%s3265_s22 + $0xe8] sm:$0xff] %vm1793_vm2, %v1758_v49  ;;  %v1916_v9 = vsel %vm1793_vm2, %v1758_v49, 0.0  ;;  %v2658_v0 = vadd.f32 %v1467_v53, %v1122_v51  ;;  %v2590_v55 = vpop.f32.mrb[34].mxu0  ;;  %v1125_v56 = vpop.f32.mrb[35].mxu1 }
 0x174   : > { %v1917_v10 = vadd.f32 %v1916_v9, %v1915_v8  ;;  %v1699_v57 = vadd.f32 %v2657_v52, %v3258_v21  ;;  %v2659_v1 = vadd.f32 %v2590_v55, %v2520_v54  ;;  %v1470_v58 = vpop.f32.mrb[35].mxu0 }
 0x175   : > { %v1697_v59 = vadd.f32 %v2658_v0, %v3258_v21  ;;  %v2660_v20 = vadd.f32 %v1470_v58, %v1125_v56 }
 0x176   : > { %v1919_v2 = vadd.f32 %v1918_v11, %v1917_v10  ;;  %v1763_v22 = vmax.f32 %v1699_v57, 0.0  ;;  %v1700_v23 = vadd.f32 %v2659_v1, %v3258_v21 }
 0x177   : > { %v1761_v3 = vmax.f32 %v1697_v59, 0.0  ;;  %v1698_v25 = vadd.f32 %v2660_v20, %v3258_v21 }
 0x178   : > { %1828 = vst.msk [vmem:[%s3265_s22 + $0x110] sm:$0xff] %vm1793_vm2, %v1763_v22  ;;  %v1921_v26 = vadd.f32 %v1920_v24, %v1919_v2  ;;  %v1764_v27 = vmax.f32 %v1700_v23, 0.0  ;;  %v2523_v28 = vpop.f32.mrb[36].mxu1  ;;  %v1926_v61 = vsel %vm1793_vm2, %v1763_v22, 0.0 }
 0x179   : > { %1826 = vst.msk [vmem:[%s3265_s22 + $0x100] sm:$0xff] %vm1793_vm2, %v1761_v3  ;;  %v1922_v12 = vsel %vm1793_vm2, %v1761_v3, 0.0  ;;  %v1762_v29 = vmax.f32 %v1698_v25, 0.0  ;;  %v2593_v30 = vpop.f32.mrb[36].mxu0  ;;  %v1138_v31 = vpop.f32.mrb[37].mxu1 }
 0x17a   : > { %v1923_v13 = vadd.f32 %v1922_v12, %v1921_v26  ;;  %1829 = vst.msk [vmem:[%s3265_s22 + $0x118] sm:$0xff] %vm1793_vm2, %v1764_v27  ;;  %v2661_v32 = vadd.f32 %v2593_v30, %v2523_v28  ;;  %v1483_v33 = vpop.f32.mrb[37].mxu0  ;;  %v2524_v34 = vpop.f32.mrb[38].mxu1  ;;  %v1928_v41 = vsel %vm1793_vm2, %v1764_v27, 0.0 }
 0x17b   : > { %1827 = vst.msk [vmem:[%s3265_s22 + $0x108] sm:$0xff] %vm1793_vm2, %v1762_v29  ;;  %v1924_v14 = vsel %vm1793_vm2, %v1762_v29, 0.0  ;;  %v2662_v60 = vadd.f32 %v1483_v33, %v1138_v31  ;;  %v2594_v4 = vpop.f32.mrb[38].mxu0  ;;  %v1141_v35 = vpop.f32.mrb[39].mxu1 }
 0x17c   : > { %v1925_v15 = vadd.f32 %v1924_v14, %v1923_v13  ;;  %v1703_v36 = vadd.f32 %v2661_v32, %v3258_v21  ;;  %v2663_v37 = vadd.f32 %v2594_v4, %v2524_v34  ;;  %v1486_v5 = vpop.f32.mrb[39].mxu0 }
 0x17d   : > { %v1701_v38 = vadd.f32 %v2662_v60, %v3258_v21  ;;  %v2664_v39 = vadd.f32 %v1486_v5, %v1141_v35 }
 0x17e   : > { %v1927_v6 = vadd.f32 %v1926_v61, %v1925_v15  ;;  %v1767_v40 = vmax.f32 %v1703_v36, 0.0  ;;  %v1704_v62 = vadd.f32 %v2663_v37, %v3258_v21 }
 0x17f   : > { %v1765_v7 = vmax.f32 %v1701_v38, 0.0  ;;  %v1702_v16 = vadd.f32 %v2664_v39, %v3258_v21 }
 0x180   : > { %1832 = vst.msk [vmem:[%s3265_s22 + $0x130] sm:$0xff] %vm1793_vm2, %v1767_v40  ;;  %v1929_v42 = vadd.f32 %v1928_v41, %v1927_v6  ;;  %v1768_v43 = vmax.f32 %v1704_v62, 0.0  ;;  %v2527_v63 = vpop.f32.mrb[40].mxu1  ;;  %v1934_v0 = vsel %vm1793_vm2, %v1767_v40, 0.0 }
 0x181   : > { %1830 = vst.msk [vmem:[%s3265_s22 + $0x120] sm:$0xff] %vm1793_vm2, %v1765_v7  ;;  %v1930_v44 = vsel %vm1793_vm2, %v1765_v7, 0.0  ;;  %v1766_v17 = vmax.f32 %v1702_v16, 0.0  ;;  %v2597_v45 = vpop.f32.mrb[40].mxu0  ;;  %v1154_v46 = vpop.f32.mrb[41].mxu1 }
 0x182   : > { %v1931_v18 = vadd.f32 %v1930_v44, %v1929_v42  ;;  %1833 = vst.msk [vmem:[%s3265_s22 + $0x138] sm:$0xff] %vm1793_vm2, %v1768_v43  ;;  %v2665_v47 = vadd.f32 %v2597_v45, %v2527_v63  ;;  %v1499_v48 = vpop.f32.mrb[41].mxu0  ;;  %v2528_v19 = vpop.f32.mrb[42].mxu1  ;;  %v1936_v58 = vsel %vm1793_vm2, %v1768_v43, 0.0 }
 0x183   : > { %1831 = vst.msk [vmem:[%s3265_s22 + $0x128] sm:$0xff] %vm1793_vm2, %v1766_v17  ;;  %v1932_v49 = vsel %vm1793_vm2, %v1766_v17, 0.0  ;;  %v2666_v50 = vadd.f32 %v1499_v48, %v1154_v46  ;;  %v2598_v51 = vpop.f32.mrb[42].mxu0  ;;  %v1157_v8 = vpop.f32.mrb[43].mxu1 }
 0x184   : > { %v1933_v52 = vadd.f32 %v1932_v49, %v1931_v18  ;;  %v1707_v53 = vadd.f32 %v2665_v47, %v3258_v21  ;;  %v2667_v54 = vadd.f32 %v2598_v51, %v2528_v19  ;;  %v1502_v9 = vpop.f32.mrb[43].mxu0 }
 0x185   : > { %v1705_v55 = vadd.f32 %v2666_v50, %v3258_v21  ;;  %v2668_v56 = vadd.f32 %v1502_v9, %v1157_v8 }
 0x186   : > { %v1935_v10 = vadd.f32 %v1934_v0, %v1933_v52  ;;  %v1771_v57 = vmax.f32 %v1707_v53, 0.0  ;;  %v1708_v1 = vadd.f32 %v2667_v54, %v3258_v21 }
 0x187   : > { %v1769_v11 = vmax.f32 %v1705_v55, 0.0  ;;  %v1706_v59 = vadd.f32 %v2668_v56, %v3258_v21 }
 0x188   : > { %1836 = vst.msk [vmem:[%s3265_s22 + $0x150] sm:$0xff] %vm1793_vm2, %v1771_v57  ;;  %v1937_v20 = vadd.f32 %v1936_v58, %v1935_v10  ;;  %v1772_v2 = vmax.f32 %v1708_v1, 0.0  ;;  %v2531_v22 = vpop.f32.mrb[44].mxu1  ;;  %v1942_v60 = vsel %vm1793_vm2, %v1771_v57, 0.0 }
 0x189   : > { %1834 = vst.msk [vmem:[%s3265_s22 + $0x140] sm:$0xff] %vm1793_vm2, %v1769_v11  ;;  %v1938_v23 = vsel %vm1793_vm2, %v1769_v11, 0.0  ;;  %v1770_v24 = vmax.f32 %v1706_v59, 0.0  ;;  %v2601_v3 = vpop.f32.mrb[44].mxu0  ;;  %v1170_v25 = vpop.f32.mrb[45].mxu1 }
 0x18a   : > { %v1939_v26 = vadd.f32 %v1938_v23, %v1937_v20  ;;  %1837 = vst.msk [vmem:[%s3265_s22 + $0x158] sm:$0xff] %vm1793_vm2, %v1772_v2  ;;  %v2669_v27 = vadd.f32 %v2601_v3, %v2531_v22  ;;  %v1515_v28 = vpop.f32.mrb[45].mxu0  ;;  %v2532_v12 = vpop.f32.mrb[46].mxu1  ;;  %v1944_v5 = vsel %vm1793_vm2, %v1772_v2, 0.0 }
 0x18b   : > { %1835 = vst.msk [vmem:[%s3265_s22 + $0x148] sm:$0xff] %vm1793_vm2, %v1770_v24  ;;  %v1940_v29 = vsel %vm1793_vm2, %v1770_v24, 0.0  ;;  %v2670_v30 = vadd.f32 %v1515_v28, %v1170_v25  ;;  %v2602_v31 = vpop.f32.mrb[46].mxu0  ;;  %v1173_v13 = vpop.f32.mrb[47].mxu1 }
 0x18c   : > { %v1941_v32 = vadd.f32 %v1940_v29, %v1939_v26  ;;  %v1711_v33 = vadd.f32 %v2669_v27, %v3258_v21  ;;  %v2671_v34 = vadd.f32 %v2602_v31, %v2532_v12  ;;  %v1518_v14 = vpop.f32.mrb[47].mxu0 }
 0x18d   : > { %v1709_v4 = vadd.f32 %v2670_v30, %v3258_v21  ;;  %v2672_v35 = vadd.f32 %v1518_v14, %v1173_v13 }
 0x18e   : > { %v1943_v15 = vadd.f32 %v1942_v60, %v1941_v32  ;;  %v1775_v36 = vmax.f32 %v1711_v33, 0.0  ;;  %v1712_v37 = vadd.f32 %v2671_v34, %v3258_v21 }
 0x18f   : > { %v1773_v61 = vmax.f32 %v1709_v4, 0.0  ;;  %v1710_v38 = vadd.f32 %v2672_v35, %v3258_v21 }
 0x190   : > { %1840 = vst.msk [vmem:[%s3265_s22 + $0x170] sm:$0xff] %vm1793_vm2, %v1775_v36  ;;  %v1945_v39 = vadd.f32 %v1944_v5, %v1943_v15  ;;  %v1776_v6 = vmax.f32 %v1712_v37, 0.0  ;;  %v2535_v40 = vpop.f32.mrb[48].mxu1  ;;  %v1950_v50 = vsel %vm1793_vm2, %v1775_v36, 0.0 }
 0x191   : > { %1838 = vst.msk [vmem:[%s3265_s22 + $0x160] sm:$0xff] %vm1793_vm2, %v1773_v61  ;;  %v1946_v62 = vsel %vm1793_vm2, %v1773_v61, 0.0  ;;  %v1774_v41 = vmax.f32 %v1710_v38, 0.0  ;;  %v2605_v7 = vpop.f32.mrb[48].mxu0  ;;  %v1186_v16 = vpop.f32.mrb[49].mxu1 }
 0x192   : > { %v1947_v42 = vadd.f32 %v1946_v62, %v1945_v39  ;;  %1841 = vst.msk [vmem:[%s3265_s22 + $0x178] sm:$0xff] %vm1793_vm2, %v1776_v6  ;;  %v2673_v43 = vadd.f32 %v2605_v7, %v2535_v40  ;;  %v1531_v63 = vpop.f32.mrb[49].mxu0  ;;  %v2536_v44 = vpop.f32.mrb[50].mxu1  ;;  %v1952_v9 = vsel %vm1793_vm2, %v1776_v6, 0.0 }
 0x193   : > { %1839 = vst.msk [vmem:[%s3265_s22 + $0x168] sm:$0xff] %vm1793_vm2, %v1774_v41  ;;  %v1948_v17 = vsel %vm1793_vm2, %v1774_v41, 0.0  ;;  %v2674_v45 = vadd.f32 %v1531_v63, %v1186_v16  ;;  %v2606_v46 = vpop.f32.mrb[50].mxu0  ;;  %v1189_v18 = vpop.f32.mrb[51].mxu1 }
 0x194   : > { %v1949_v47 = vadd.f32 %v1948_v17, %v1947_v42  ;;  %v1715_v48 = vadd.f32 %v2673_v43, %v3258_v21  ;;  %v2675_v19 = vadd.f32 %v2606_v46, %v2536_v44  ;;  %v1534_v49 = vpop.f32.mrb[51].mxu0 }
 0x195   : > { %v1713_v51 = vadd.f32 %v2674_v45, %v3258_v21  ;;  %v2676_v8 = vadd.f32 %v1534_v49, %v1189_v18 }
 0x196   : > { %v1951_v52 = vadd.f32 %v1950_v50, %v1949_v47  ;;  %v1779_v53 = vmax.f32 %v1715_v48, 0.0  ;;  %v1716_v54 = vadd.f32 %v2675_v19, %v3258_v21 }
 0x197   : > { %v1777_v0 = vmax.f32 %v1713_v51, 0.0  ;;  %v1714_v55 = vadd.f32 %v2676_v8, %v3258_v21 }
 0x198   : > { %1844 = vst.msk [vmem:[%s3265_s22 + $0x190] sm:$0xff] %vm1793_vm2, %v1779_v53  ;;  %v1953_v56 = vadd.f32 %v1952_v9, %v1951_v52  ;;  %v1780_v10 = vmax.f32 %v1716_v54, 0.0  ;;  %v2539_v57 = vpop.f32.mrb[52].mxu1  ;;  %v1958_v30 = vsel %vm1793_vm2, %v1779_v53, 0.0 }
 0x199   : > { %1842 = vst.msk [vmem:[%s3265_s22 + $0x180] sm:$0xff] %vm1793_vm2, %v1777_v0  ;;  %v1954_v1 = vsel %vm1793_vm2, %v1777_v0, 0.0  ;;  %v1778_v58 = vmax.f32 %v1714_v55, 0.0  ;;  %v2609_v11 = vpop.f32.mrb[52].mxu0  ;;  %v1202_v59 = vpop.f32.mrb[53].mxu1 }
 0x19a   : > { %v1955_v20 = vadd.f32 %v1954_v1, %v1953_v56  ;;  %1845 = vst.msk [vmem:[%s3265_s22 + $0x198] sm:$0xff] %vm1793_vm2, %v1780_v10  ;;  %v2677_v2 = vadd.f32 %v2609_v11, %v2539_v57  ;;  %v1547_v22 = vpop.f32.mrb[53].mxu0  ;;  %v2540_v23 = vpop.f32.mrb[54].mxu1  ;;  %v1960_v14 = vsel %vm1793_vm2, %v1780_v10, 0.0 }
 0x19b   : > { %1843 = vst.msk [vmem:[%s3265_s22 + $0x188] sm:$0xff] %vm1793_vm2, %v1778_v58  ;;  %v1956_v24 = vsel %vm1793_vm2, %v1778_v58, 0.0  ;;  %v2678_v3 = vadd.f32 %v1547_v22, %v1202_v59  ;;  %v2610_v25 = vpop.f32.mrb[54].mxu0  ;;  %v1205_v26 = vpop.f32.mrb[55].mxu1 }
 0x19c   : > { %v1957_v27 = vadd.f32 %v1956_v24, %v1955_v20  ;;  %v1719_v28 = vadd.f32 %v2677_v2, %v3258_v21  ;;  %v2679_v12 = vadd.f32 %v2610_v25, %v2540_v23  ;;  %v1550_v29 = vpop.f32.mrb[55].mxu0 }
 0x19d   : > { %v1717_v31 = vadd.f32 %v2678_v3, %v3258_v21  ;;  %v2680_v13 = vadd.f32 %v1550_v29, %v1205_v26 }
 0x19e   : > { %v1959_v32 = vadd.f32 %v1958_v30, %v1957_v27  ;;  %v1783_v33 = vmax.f32 %v1719_v28, 0.0  ;;  %v1720_v34 = vadd.f32 %v2679_v12, %v3258_v21 }
 0x19f   : > { %v1781_v60 = vmax.f32 %v1717_v31, 0.0  ;;  %v1718_v4 = vadd.f32 %v2680_v13, %v3258_v21 }
 0x1a0   : > { %1848 = vst.msk [vmem:[%s3265_s22 + $0x1b0] sm:$0xff] %vm1793_vm2, %v1783_v33  ;;  %v1961_v35 = vadd.f32 %v1960_v14, %v1959_v32  ;;  %v1784_v15 = vmax.f32 %v1720_v34, 0.0  ;;  %v2543_v36 = vpop.f32.mrb[56].mxu1  ;;  %v1966_v45 = vsel %vm1793_vm2, %v1783_v33, 0.0 }
 0x1a1   : > { %1846 = vst.msk [vmem:[%s3265_s22 + $0x1a0] sm:$0xff] %vm1793_vm2, %v1781_v60  ;;  %v1962_v37 = vsel %vm1793_vm2, %v1781_v60, 0.0  ;;  %v1782_v5 = vmax.f32 %v1718_v4, 0.0  ;;  %v2613_v61 = vpop.f32.mrb[56].mxu0  ;;  %v1218_v38 = vpop.f32.mrb[57].mxu1 }
 0x1a2   : > { %v1963_v39 = vadd.f32 %v1962_v37, %v1961_v35  ;;  %1849 = vst.msk [vmem:[%s3265_s22 + $0x1b8] sm:$0xff] %vm1793_vm2, %v1784_v15  ;;  %v2681_v6 = vadd.f32 %v2613_v61, %v2543_v36  ;;  %v1563_v40 = vpop.f32.mrb[57].mxu0  ;;  %v2544_v62 = vpop.f32.mrb[58].mxu1  ;;  %v1968_v49 = vsel %vm1793_vm2, %v1784_v15, 0.0 }
 0x1a3   : > { %1847 = vst.msk [vmem:[%s3265_s22 + $0x1a8] sm:$0xff] %vm1793_vm2, %v1782_v5  ;;  %v1964_v41 = vsel %vm1793_vm2, %v1782_v5, 0.0  ;;  %v2682_v7 = vadd.f32 %v1563_v40, %v1218_v38  ;;  %v2614_v16 = vpop.f32.mrb[58].mxu0  ;;  %v1221_v42 = vpop.f32.mrb[59].mxu1 }
 0x1a4   : > { %v1965_v43 = vadd.f32 %v1964_v41, %v1963_v39  ;;  %v1723_v63 = vadd.f32 %v2681_v6, %v3258_v21  ;;  %v2683_v44 = vadd.f32 %v2614_v16, %v2544_v62  ;;  %v1566_v17 = vpop.f32.mrb[59].mxu0  ;;  %v1858_v6 = vld [vmem:[%s3288_s24] sm:$0x1] }
 0x1a5   : > { %v1721_v46 = vadd.f32 %v2682_v7, %v3258_v21  ;;  %v2684_v18 = vadd.f32 %v1566_v17, %v1221_v42 }
 0x1a6   : > { %v1967_v47 = vadd.f32 %v1966_v45, %v1965_v43  ;;  %v1787_v48 = vmax.f32 %v1723_v63, 0.0  ;;  %v1724_v19 = vadd.f32 %v2683_v44, %v3258_v21 }
 0x1a7   : > { %v1785_v50 = vmax.f32 %v1721_v46, 0.0  ;;  %v1722_v51 = vadd.f32 %v2684_v18, %v3258_v21 }
 0x1a8   : > { %1852 = vst.msk [vmem:[%s3265_s22 + $0x1d0] sm:$0xff] %vm1793_vm2, %v1787_v48  ;;  %v1969_v8 = vadd.f32 %v1968_v49, %v1967_v47  ;;  %v1788_v52 = vmax.f32 %v1724_v19, 0.0  ;;  %v2547_v53 = vpop.f32.mrb[60].mxu1  ;;  %v1974_v3 = vsel %vm1793_vm2, %v1787_v48, 0.0 }
 0x1a9   : > { %1850 = vst.msk [vmem:[%s3265_s22 + $0x1c0] sm:$0xff] %vm1793_vm2, %v1785_v50  ;;  %v1970_v54 = vsel %vm1793_vm2, %v1785_v50, 0.0  ;;  %v1786_v9 = vmax.f32 %v1722_v51, 0.0  ;;  %v2617_v0 = vpop.f32.mrb[60].mxu0  ;;  %v1234_v55 = vpop.f32.mrb[61].mxu1 }
 0x1aa   : > { %v1971_v56 = vadd.f32 %v1970_v54, %v1969_v8  ;;  %1853 = vst.msk [vmem:[%s3265_s22 + $0x1d8] sm:$0xff] %vm1793_vm2, %v1788_v52  ;;  %v2685_v10 = vadd.f32 %v2617_v0, %v2547_v53  ;;  %v1579_v57 = vpop.f32.mrb[61].mxu0  ;;  %v2548_v1 = vpop.f32.mrb[62].mxu1  ;;  %v1976_v29 = vsel %vm1793_vm2, %v1788_v52, 0.0 }
 0x1ab   : > { %1851 = vst.msk [vmem:[%s3265_s22 + $0x1c8] sm:$0xff] %vm1793_vm2, %v1786_v9  ;;  %v1972_v58 = vsel %vm1793_vm2, %v1786_v9, 0.0  ;;  %v2686_v11 = vadd.f32 %v1579_v57, %v1234_v55  ;;  %v2618_v59 = vpop.f32.mrb[62].mxu0  ;;  %v1237_v20 = vpop.f32.mrb[63].mxu1 }
 0x1ac   : > { %v1973_v2 = vadd.f32 %v1972_v58, %v1971_v56  ;;  %v1727_v22 = vadd.f32 %v2685_v10, %v3258_v21  ;;  %v2687_v23 = vadd.f32 %v2618_v59, %v2548_v1  ;;  %v1582_v24 = vpop.f32.mrb[63].mxu0 }
 0x1ad   : > { %v1725_v25 = vadd.f32 %v2686_v11, %v3258_v21  ;;  %v2688_v26 = vadd.f32 %v1582_v24, %v1237_v20 }
 0x1ae   : > { %v1975_v27 = vadd.f32 %v1974_v3, %v1973_v2  ;;  %v1791_v28 = vmax.f32 %v1727_v22, 0.0  ;;  %v1728_v12 = vadd.f32 %v2687_v23, %v3258_v21 }
 0x1af   : > { %v1789_v30 = vmax.f32 %v1725_v25, 0.0  ;;  %v1726_v31 = vadd.f32 %v2688_v26, %v3258_v21 }
 0x1b0   : > { %1856 = vst.msk [vmem:[%s3265_s22 + $0x1f0] sm:$0xff] %vm1793_vm2, %v1791_v28  ;;  %v1977_v13 = vadd.f32 %v1976_v29, %v1975_v27  ;;  %v1792_v32 = vmax.f32 %v1728_v12, 0.0  ;;  %v1982_v4 = vsel %vm1793_vm2, %v1791_v28, 0.0 }
 0x1b1   : > { %1854 = vst.msk [vmem:[%s3265_s22 + $0x1e0] sm:$0xff] %vm1793_vm2, %v1789_v30  ;;  %v1978_v33 = vsel %vm1793_vm2, %v1789_v30, 0.0  ;;  %v1790_v34 = vmax.f32 %v1726_v31, 0.0 }
 0x1b2   : > { %v1979_v14 = vadd.f32 %v1978_v33, %v1977_v13  ;;  %1857 = vst.msk [vmem:[%s3265_s22 + $0x1f8] sm:$0xff] %vm1793_vm2, %v1792_v32  ;;  %v1984_v15 = vsel %vm1793_vm2, %v1792_v32, 0.0 }
 0x1b3   : > { %1855 = vst.msk [vmem:[%s3265_s22 + $0x1e8] sm:$0xff] %vm1793_vm2, %v1790_v34  ;;  %v1980_v60 = vsel %vm1793_vm2, %v1790_v34, 0.0 }
 0x1b4   : > { %v1981_v21 = vadd.f32 %v1980_v60, %v1979_v14 }
 0x1b6   : > { %v1983_v35 = vadd.f32 %v1982_v4, %v1981_v21 }
 0x1b8   : > { %v1985_v36 = vadd.f32 %v1984_v15, %v1983_v35 }
 0x1ba   : > { %v1986_v37 = vrot.slane %v1985_v36, 4 }
 0x1bc   : > { %v1987_v5 = vadd.f32 %v1986_v37, %v1985_v36 }
 0x1be   : > { %v1988_v61 = vrot.slane %v1987_v5, 2 }
 0x1c0   : > { %v1989_v38 = vadd.f32 %v1988_v61, %v1987_v5 }
 0x1c2   : > { %v1990_v39 = vrot.slane %v1989_v38, 1 }
 0x1c4   : > { %v1991_v40 = vadd.f32 %v1990_v39, %v1989_v38 }
 0x1c6   : > { %v1992_v62 = vadd.f32 %v1991_v40, %v1858_v6 }
 0x1c8   : > { %1994 = vst.msk [vmem:[%s3288_s24] sm:$0x1] %vm252_vm3, %v1992_v62 }
 0x1c9   : > { %2876 = shalt.err (!%p2873_p5)
}
 0x1ca   : > { %s2877_s12 = scalar_lea.hbm %s3560_s6, 16  ;;  %s2881_s21 = scalar_lea.hbm %s3615_s4, 32 }
 0x1cb   : > { %p2878_p6 = scmp.ne.s32.totalorder %s3560_s6, %s2877_s12  ;;  %p2882_p10 = scmp.lt.u32.totalorder %s3560_s6, %s3615_s4 }
 0x1cc   : > { %p2883_p11 = scmp.lt.u32.totalorder %s2881_s21, %s2877_s12  ;;  %p2885_p13 = scmp.lt.u32.totalorder %s2877_s12, %s3560_s6 }
 0x1cd   : > { %p2879_p7 = pnand %p2878_p6, %p3010_p4 }
 0x1ce   : > { %p2884_p12 = por %p2883_p11, %p2882_p10 }
 0x1cf   : > { %p2880_p9 = pneg %p2879_p7 }
 0x1d0   : > { %p2886_p0 = por %p2885_p13, %p2884_p12 }
 0x1d2   : > { %p2887_p1 = pnand %p2886_p0, %p2880_p9 }
 0x1d4   : > { %2890 = shalt.err (!%p2887_p1)
}
 0x1d5   : > { %2758 = dma.vmem_to_hbm [thread:$0]  (%p3010_p4), %s3562_s29, 16, %s3560_s6, %s2006_s7  }
 0x1d6 PF: > { %p2764_p2 = scmp.ge.s32.totalorder %s2941_s20, 2  ;;  %s2047_s24 = sand.u32 1, %s2921_s15  }
 0x1d7   : > { %s2048_s26 = scalar_lea.sflag [#allocation3], %s2047_s24 }
 0x1d8   : > { %p2761_p3 = pnand %p2764_p2, %p3017_p8 }
 0x1da   : > { %2916 = dma.done.wait (!%p2761_p3), %s2048_s26, 16  }
 0x1db   : > { %2918 = vsyncadd (!%p2761_p3), %s2048_s26, 4294967280  ;;  %s18_s20 = sadd.s32 1, %s2941_s20   ;;  %s3618_s15 = smov %s2925_s16 }
 0x1dc   : > { %p15_p5 = scmp.ge.s32.totalorder %s18_s20, 4   ;;  %s3619_s16 = smov %s2929_s17 }
 0x1dd   : > { %s3620_s17 = smov %s3023_s28  ;;  %s3621_s18 = smov %s2937_s19 }
 0x1de   : > { %s3622_s19 = smov %s3624_s23  ;;  %17 = sbr.rel (!%p15_p5) target bundleno = 4 (0x4), region = 85 }
 0x1e5   :  { %2052 = vsyncpa [#allocation3], 1 }
 0x1e6   :  { %2054 = vsyncpa [#allocation3 + $0x1], 1 }

</bundles_post_ra>
